<compile_context>
chip_gen: v5e
topology: v5e:2x2
jax: 0.10.0
libtpu: 0.0.40
codegen_flags: <defaults>
</compile_context>

<pallas_src>
import functools

import jax
import jax.numpy as jnp
from jax.experimental import pallas as pl
from jax.experimental.pallas import tpu as pltpu

# ----------------------------- model config (small) -----------------------------
CHANNELS = [[16, 16], [32, 32]]   # two stages, two (bottleneck) units each
INIT_BLOCK_CHANNELS = 16
BOTTLENECK_FACTOR = 4
IN_CHANNELS = 3
IN_SIZE = (32, 32)
NUM_CLASSES = 10
BN_EPS = 1e-5

MAX_TILE_ROWS = 256   # row tile; M>256 -> >=2 "parallel" grid steps (feeds both v7x TCs)


# ----------------------------- Pallas kernels -----------------------------------
def _mm_kernel(x_ref, w_ref, b_ref, o_ref, *, relu):
    """Matmul (bf16 in, f32 acc) + bias (+ optional ReLU)."""
    y = jnp.dot(x_ref[...], w_ref[...], preferred_element_type=jnp.float32)
    y = y + b_ref[...]
    if relu:
        y = jnp.maximum(y, 0.0)
    o_ref[...] = y.astype(o_ref.dtype)


def _mm_res_kernel(x_ref, w_ref, b_ref, r_ref, o_ref):
    """Matmul + bias + residual add + ReLU, fused epilogue of a ResAUnit."""
    y = jnp.dot(x_ref[...], w_ref[...], preferred_element_type=jnp.float32)
    o_ref[...] = jnp.maximum(y + b_ref[...] + r_ref[...], 0.0).astype(o_ref.dtype)


def _max_reduce_kernel(x_ref, o_ref):
    """Elementwise max over the leading (window-tap) axis."""
    o_ref[...] = jnp.max(x_ref[...], axis=0)


# ----------------------------- Pallas wrappers -----------------------------------
def _row_tiling(m):
    """(tile_rows, padded_rows, grid) for the row axis of the matmul kernels."""
    if m <= MAX_TILE_ROWS:
        return m, m, 1                       # single full-dim block, no padding
    tm = MAX_TILE_ROWS
    mp = ((m + tm - 1) // tm) * tm
    return tm, mp, mp // tm


def matmul_bias(x, w, bias, relu=False, residual=None):
    """x:(M,K) @ w:(K,N) + bias [+ residual, ReLU].  Fused matmul/BN/act on MXU."""
    m, k = x.shape
    n = w.shape[1]
    tm, mp, grid_m = _row_tiling(m)

    xp = x.astype(jnp.bfloat16)              # bf16 inputs, f32 accumulate
    if mp != m:
        xp = jnp.pad(xp, ((0, mp - m), (0, 0)))

    args = [xp, w.astype(jnp.bfloat16), bias.reshape(1, n).astype(jnp.float32)]
    in_specs = [
        pl.BlockSpec((tm, k), lambda i: (i, 0)),
        pl.BlockSpec((k, n), lambda i: (0, 0)),
        pl.BlockSpec((1, n), lambda i: (0, 0)),
    ]
    if residual is None:
        kernel = functools.partial(_mm_kernel, relu=relu)
    else:
        r = residual.astype(jnp.float32)
        if mp != m:
            r = jnp.pad(r, ((0, mp - m), (0, 0)))
        args.append(r)
        in_specs.append(pl.BlockSpec((tm, n), lambda i: (i, 0)))
        kernel = _mm_res_kernel

    out = pl.pallas_call(
        kernel,
        out_shape=jax.ShapeDtypeStruct((mp, n), jnp.float32),
        grid=(grid_m,),
        in_specs=in_specs,
        out_specs=pl.BlockSpec((tm, n), lambda i: (i, 0)),
        compiler_params=pltpu.CompilerParams(dimension_semantics=("parallel",)),
    )(*args)
    return out if mp == m else out[:m]


# ----------------------------- glue: im2col / pooling ----------------------------
def im2col(x, kh, kw, stride, padding, dilation=1):
    """NHWC -> (N*Ho*Wo, kh*kw*Cin) patches (zero-padded conv semantics)."""
    n, h, w, c = x.shape
    if kh == 1 and kw == 1 and padding == 0 and dilation == 1:
        if stride != 1:
            x = x[:, ::stride, ::stride, :]
        ho, wo = x.shape[1], x.shape[2]
        return x.reshape(n * ho * wo, c), ho, wo
    ho = (h + 2 * padding - dilation * (kh - 1) - 1) // stride + 1
    wo = (w + 2 * padding - dilation * (kw - 1) - 1) // stride + 1
    xp = jnp.pad(x, ((0, 0), (padding, padding), (padding, padding), (0, 0)))
    pats = []
    for i in range(kh):
        for j in range(kw):
            di, dj = i * dilation, j * dilation
            pats.append(xp[:, di:di + stride * (ho - 1) + 1:stride,
                           dj:dj + stride * (wo - 1) + 1:stride, :])
    col = jnp.stack(pats, axis=3).reshape(n * ho * wo, kh * kw * c)
    return col, ho, wo


def conv_block(x, p, stride=1, padding=0, dilation=1, relu=True, residual=None):
    """conv(bias=False) + folded BN (+ fused residual add) + optional ReLU."""
    kh, kw, cin, cout = p["w"].shape
    col, ho, wo = im2col(x, kh, kw, stride, padding, dilation)
    res = residual.reshape(-1, cout) if residual is not None else None
    y = matmul_bias(col, p["w"].reshape(kh * kw * cin, cout), p["bias"],
                    relu=relu, residual=res)
    return y.reshape(x.shape[0], ho, wo, cout)


def maxpool2d(x, k, stride, padding):
    n, h, w, c = x.shape
    ho = (h + 2 * padding - k) // stride + 1
    wo = (w + 2 * padding - k) // stride + 1
    xp = jnp.pad(x.astype(jnp.float32),
                 ((0, 0), (padding, padding), (padding, padding), (0, 0)),
                 constant_values=-jnp.inf)
    pats = []
    for i in range(k):
        for j in range(k):
            pats.append(xp[:, i:i + stride * (ho - 1) + 1:stride,
                           j:j + stride * (wo - 1) + 1:stride, :])
    flat = n * ho * wo * c
    stacked = jnp.stack(pats, 0).reshape(k * k, flat)
    if flat % 128 == 0:
        stacked = stacked.reshape(k * k, flat // 128, 128)   # lane-dense blocks
    else:
        stacked = stacked.reshape(k * k, n * ho * wo, c)
    out = pl.pallas_call(
        _max_reduce_kernel,
        out_shape=jax.ShapeDtypeStruct(stacked.shape[1:], jnp.float32),
    )(stacked)
    return out.reshape(n, ho, wo, c)


# ----------------------------- parameters ----------------------------------------
def _kaiming_uniform(key, shape, fan_in):
    bound = jnp.sqrt(6.0 / fan_in)  # gain=sqrt(2), kaiming_uniform fan_in
    return jax.random.uniform(key, shape, jnp.float32, -bound, bound)


def _make_conv(key, kh, kw, cin, cout):
    w = _kaiming_uniform(key, (kh, kw, cin, cout), kh * kw * cin)  # HWIO
    scale = 1.0 / jnp.sqrt(1.0 + BN_EPS)   # BN fold: identity running stats, gamma=1, beta=0
    return dict(w=w * scale, bias=jnp.zeros((cout,), jnp.float32))


def build_params(key):
    keys = jax.random.split(key, 64)
    it = iter(keys)
    nk = lambda: next(it)

    params = {}
    mid = INIT_BLOCK_CHANNELS // 2
    params["init"] = {
        "conv1": _make_conv(nk(), 3, 3, IN_CHANNELS, mid),
        "conv2": _make_conv(nk(), 3, 3, mid, mid),
        "conv3": _make_conv(nk(), 3, 3, mid, INIT_BLOCK_CHANNELS),
    }
    cin = INIT_BLOCK_CHANNELS
    stages = []
    for i, stage_channels in enumerate(CHANNELS):
        units = []
        for j, cout in enumerate(stage_channels):
            stride = 2 if (j == 0 and i != 0) else 1
            midc = cout // BOTTLENECK_FACTOR
            u = {
                "conv1": _make_conv(nk(), 1, 1, cin, midc),
                "conv2": _make_conv(nk(), 3, 3, midc, midc),
                "conv3": _make_conv(nk(), 1, 1, midc, cout),
            }
            if cin != cout or stride != 1:
                u["id_conv"] = _make_conv(nk(), 1, 1, cin, cout)
            units.append(u)
            cin = cout
        stages.append(units)
    params["stages"] = stages

    bound = 1.0 / jnp.sqrt(cin)
    params["fc_w"] = jax.random.uniform(nk(), (cin, NUM_CLASSES), jnp.float32, -bound, bound)
    params["fc_b"] = jax.random.uniform(nk(), (NUM_CLASSES,), jnp.float32, -bound, bound)
    return params


# ----------------------------- forward --------------------------------------------
def resneta_forward(params, x_nchw):
    x = jnp.transpose(x_nchw, (0, 2, 3, 1)).astype(jnp.float32)  # NCHW -> NHWC

    # SEInitBlock: 3x conv3x3(BN,ReLU) + maxpool 3x3/s2/p1
    p = params["init"]
    x = conv_block(x, p["conv1"], stride=2, padding=1, relu=True)
    x = conv_block(x, p["conv2"], stride=1, padding=1, relu=True)
    x = conv_block(x, p["conv3"], stride=1, padding=1, relu=True)
    x = maxpool2d(x, k=3, stride=2, padding=1)

    # stages of ResAUnit (bottleneck, conv1_stride=False, dilation=1)
    for i, units in enumerate(params["stages"]):
        for j, u in enumerate(units):
            stride = 2 if (j == 0 and i != 0) else 1
            if "id_conv" in u:
                if stride != 1:
                    # ResADownBlock fused: avgpool(k=stride,s=stride) + 1x1 conv(BN) ==
                    # one kxk stride-k conv with weights replicated over the window / k^2.
                    # TODO(synk): handle non-divisible spatial sizes (ceil_mode partial windows).
                    kk = stride
                    w1 = u["id_conv"]["w"]  # (1,1,cin,cout), BN already folded
                    wf = jnp.broadcast_to(w1, (kk, kk) + w1.shape[2:]) / float(kk * kk)
                    ident = conv_block(x, {"w": wf, "bias": u["id_conv"]["bias"]},
                                       stride=kk, padding=0, relu=False)
                else:
                    ident = conv_block(x, u["id_conv"], relu=False)
            else:
                ident = x
            y = conv_block(x, u["conv1"], relu=True)
            y = conv_block(y, u["conv2"], stride=stride, padding=1, relu=True)
            # conv3 + BN + residual add + ReLU fused into a single Pallas matmul
            x = conv_block(y, u["conv3"], residual=ident)

    # AdaptiveAvgPool2d(1) + flatten + Linear, with the (linear) pool commuted past
    # the FC:  mean_hw(X) @ W + b  ==  mean_hw(X @ W + b).  One Pallas matmul, then
    # a tiny XLA mean over the H*W axis (2 x 16 x 10 -> 2 x 10).
    n, h, w, c = x.shape
    z = matmul_bias(x.reshape(n * h * w, c), params["fc_w"], params["fc_b"], relu=False)
    logits = jnp.mean(z.reshape(n, h * w, NUM_CLASSES), axis=1)
    return logits


# ----------------------------- main ------------------------------------------------
if __name__ == "__main__":
    key = jax.random.PRNGKey(0)
    pkey, xkey = jax.random.split(key)
    params = build_params(pkey)
    x = jax.random.normal(xkey, (2, IN_CHANNELS, IN_SIZE[0], IN_SIZE[1]), jnp.float32)

    logits = jax.jit(resneta_forward)(params, x)
    logits = jax.block_until_ready(logits)
    assert logits.shape == (2, NUM_CLASSES)
    assert bool(jnp.all(jnp.isfinite(logits)))
    print("KERNEL_OK")
</pallas_src>

<mosaic_0001>
module attributes {stable_mosaic.version = 11 : i64} {
  func.func @_mm_kernel(%arg0: i32, %arg1: memref<256x27xbf16, #tpu.memory_space<vmem>>, %arg2: memref<27x8xbf16, #tpu.memory_space<vmem>>, %arg3: memref<1x8xf32, #tpu.memory_space<vmem>>, %arg4: memref<256x8xf32, #tpu.memory_space<vmem>>) attributes {dimension_semantics = [#tpu.dimension_semantics<parallel>], iteration_bounds = array<i64: 2>, scalar_prefetch = 0 : i64, scratch_operands = 0 : i64, tpu.core_type = #tpu.core_type<tc>, window_params = [{transform_indices = @transform_0, window_bounds = array<i64: 256, 27>}, {pipeline_mode = #tpu.pipeline_mode<synchronous>, transform_indices = @transform_1, window_bounds = array<i64: 27, 8>}, {pipeline_mode = #tpu.pipeline_mode<synchronous>, transform_indices = @transform_2, window_bounds = array<i64: 1, 8>}, {transform_indices = @transform_3, window_bounds = array<i64: 256, 8>}]} {
    %c0 = arith.constant 0 : index
    %c0_0 = arith.constant 0 : index
    %0 = vector.load %arg1[%c0, %c0_0] : memref<256x27xbf16, #tpu.memory_space<vmem>>, vector<256x27xbf16>
    %c0_1 = arith.constant 0 : index
    %c0_2 = arith.constant 0 : index
    %1 = vector.load %arg2[%c0_1, %c0_2] : memref<27x8xbf16, #tpu.memory_space<vmem>>, vector<27x8xbf16>
    %cst = arith.constant dense<0.000000e+00> : vector<256x8xf32>
    %2 = tpu.matmul %0, %1, %cst {dimension_numbers = #tpu.dot_dimension_numbers<[1], [0], [0], [1], [0, 0, 1, 1], [], []>} : vector<256x27xbf16>, vector<27x8xbf16>, vector<256x8xf32> -> vector<256x8xf32>
    %c0_3 = arith.constant 0 : index
    %c0_4 = arith.constant 0 : index
    %3 = vector.load %arg3[%c0_3, %c0_4] : memref<1x8xf32, #tpu.memory_space<vmem>>, vector<1x8xf32>
    %4 = vector.broadcast %3 : vector<1x8xf32> to vector<256x8xf32>
    %5 = arith.addf %2, %4 : vector<256x8xf32>
    %cst_5 = arith.constant 0.000000e+00 : f32
    %6 = vector.broadcast %cst_5 : f32 to vector<256x8xf32>
    %7 = arith.maximumf %5, %6 : vector<256x8xf32>
    %c0_6 = arith.constant 0 : index
    %c0_7 = arith.constant 0 : index
    %8 = vector.load %arg4[%c0_6, %c0_7] : memref<256x8xf32, #tpu.memory_space<vmem>>, vector<256x8xf32>
    tpu.vector_store %arg4[%c0_6, %c0_7], %7 {strides = array<i32>} : memref<256x8xf32, #tpu.memory_space<vmem>>, vector<256x8xf32>,
    return
  }
  func.func @transform_0(%arg0: i32) -> (i32, i32) {
    %c0_i32 = arith.constant 0 : i32
    %c0_i32_0 = arith.constant 0 : i32
    return %arg0, %c0_i32 : i32, i32
  }
  func.func @transform_1(%arg0: i32) -> (i32, i32) {
    %c0_i32 = arith.constant 0 : i32
    %c0_i32_0 = arith.constant 0 : i32
    %c0_i32_1 = arith.constant 0 : i32
    return %c0_i32, %c0_i32_0 : i32, i32
  }
  func.func @transform_2(%arg0: i32) -> (i32, i32) {
    %c0_i32 = arith.constant 0 : i32
    %c0_i32_0 = arith.constant 0 : i32
    %c0_i32_1 = arith.constant 0 : i32
    return %c0_i32, %c0_i32_0 : i32, i32
  }
  func.func @transform_3(%arg0: i32) -> (i32, i32) {
    %c0_i32 = arith.constant 0 : i32
    %c0_i32_0 = arith.constant 0 : i32
    return %arg0, %c0_i32 : i32, i32
  }
}

module attributes {stable_mosaic.version = 11 : i64} {
  func.func @_mm_kernel(%arg0: i32, %arg1: memref<256x72xbf16, #tpu.memory_space<vmem>>, %arg2: memref<72x16xbf16, #tpu.memory_space<vmem>>, %arg3: memref<1x16xf32, #tpu.memory_space<vmem>>, %arg4: memref<256x16xf32, #tpu.memory_space<vmem>>) attributes {dimension_semantics = [#tpu.dimension_semantics<parallel>], iteration_bounds = array<i64: 2>, scalar_prefetch = 0 : i64, scratch_operands = 0 : i64, tpu.core_type = #tpu.core_type<tc>, window_params = [{transform_indices = @transform_0, window_bounds = array<i64: 256, 72>}, {pipeline_mode = #tpu.pipeline_mode<synchronous>, transform_indices = @transform_1, window_bounds = array<i64: 72, 16>}, {pipeline_mode = #tpu.pipeline_mode<synchronous>, transform_indices = @transform_2, window_bounds = array<i64: 1, 16>}, {transform_indices = @transform_3, window_bounds = array<i64: 256, 16>}]} {
    %c0 = arith.constant 0 : index
    %c0_0 = arith.constant 0 : index
    %0 = vector.load %arg1[%c0, %c0_0] : memref<256x72xbf16, #tpu.memory_space<vmem>>, vector<256x72xbf16>
    %c0_1 = arith.constant 0 : index
    %c0_2 = arith.constant 0 : index
    %1 = vector.load %arg2[%c0_1, %c0_2] : memref<72x16xbf16, #tpu.memory_space<vmem>>, vector<72x16xbf16>
    %cst = arith.constant dense<0.000000e+00> : vector<256x16xf32>
    %2 = tpu.matmul %0, %1, %cst {dimension_numbers = #tpu.dot_dimension_numbers<[1], [0], [0], [1], [0, 0, 1, 1], [], []>} : vector<256x72xbf16>, vector<72x16xbf16>, vector<256x16xf32> -> vector<256x16xf32>
    %c0_3 = arith.constant 0 : index
    %c0_4 = arith.constant 0 : index
    %3 = vector.load %arg3[%c0_3, %c0_4] : memref<1x16xf32, #tpu.memory_space<vmem>>, vector<1x16xf32>
    %4 = vector.broadcast %3 : vector<1x16xf32> to vector<256x16xf32>
    %5 = arith.addf %2, %4 : vector<256x16xf32>
    %cst_5 = arith.constant 0.000000e+00 : f32
    %6 = vector.broadcast %cst_5 : f32 to vector<256x16xf32>
    %7 = arith.maximumf %5, %6 : vector<256x16xf32>
    %c0_6 = arith.constant 0 : index
    %c0_7 = arith.constant 0 : index
    %8 = vector.load %arg4[%c0_6, %c0_7] : memref<256x16xf32, #tpu.memory_space<vmem>>, vector<256x16xf32>
    tpu.vector_store %arg4[%c0_6, %c0_7], %7 {strides = array<i32>} : memref<256x16xf32, #tpu.memory_space<vmem>>, vector<256x16xf32>,
    return
  }
  func.func @transform_0(%arg0: i32) -> (i32, i32) {
    %c0_i32 = arith.constant 0 : i32
    %c0_i32_0 = arith.constant 0 : i32
    return %arg0, %c0_i32 : i32, i32
  }
  func.func @transform_1(%arg0: i32) -> (i32, i32) {
    %c0_i32 = arith.constant 0 : i32
    %c0_i32_0 = arith.constant 0 : i32
    %c0_i32_1 = arith.constant 0 : i32
    return %c0_i32, %c0_i32_0 : i32, i32
  }
  func.func @transform_2(%arg0: i32) -> (i32, i32) {
    %c0_i32 = arith.constant 0 : i32
    %c0_i32_0 = arith.constant 0 : i32
    %c0_i32_1 = arith.constant 0 : i32
    return %c0_i32, %c0_i32_0 : i32, i32
  }
  func.func @transform_3(%arg0: i32) -> (i32, i32) {
    %c0_i32 = arith.constant 0 : i32
    %c0_i32_0 = arith.constant 0 : i32
    return %arg0, %c0_i32 : i32, i32
  }
}

module attributes {stable_mosaic.version = 11 : i64} {
  func.func @_mm_kernel(%arg0: i32, %arg1: memref<256x72xbf16, #tpu.memory_space<vmem>>, %arg2: memref<72x8xbf16, #tpu.memory_space<vmem>>, %arg3: memref<1x8xf32, #tpu.memory_space<vmem>>, %arg4: memref<256x8xf32, #tpu.memory_space<vmem>>) attributes {dimension_semantics = [#tpu.dimension_semantics<parallel>], iteration_bounds = array<i64: 2>, scalar_prefetch = 0 : i64, scratch_operands = 0 : i64, tpu.core_type = #tpu.core_type<tc>, window_params = [{transform_indices = @transform_0, window_bounds = array<i64: 256, 72>}, {pipeline_mode = #tpu.pipeline_mode<synchronous>, transform_indices = @transform_1, window_bounds = array<i64: 72, 8>}, {pipeline_mode = #tpu.pipeline_mode<synchronous>, transform_indices = @transform_2, window_bounds = array<i64: 1, 8>}, {transform_indices = @transform_3, window_bounds = array<i64: 256, 8>}]} {
    %c0 = arith.constant 0 : index
    %c0_0 = arith.constant 0 : index
    %0 = vector.load %arg1[%c0, %c0_0] : memref<256x72xbf16, #tpu.memory_space<vmem>>, vector<256x72xbf16>
    %c0_1 = arith.constant 0 : index
    %c0_2 = arith.constant 0 : index
    %1 = vector.load %arg2[%c0_1, %c0_2] : memref<72x8xbf16, #tpu.memory_space<vmem>>, vector<72x8xbf16>
    %cst = arith.constant dense<0.000000e+00> : vector<256x8xf32>
    %2 = tpu.matmul %0, %1, %cst {dimension_numbers = #tpu.dot_dimension_numbers<[1], [0], [0], [1], [0, 0, 1, 1], [], []>} : vector<256x72xbf16>, vector<72x8xbf16>, vector<256x8xf32> -> vector<256x8xf32>
    %c0_3 = arith.constant 0 : index
    %c0_4 = arith.constant 0 : index
    %3 = vector.load %arg3[%c0_3, %c0_4] : memref<1x8xf32, #tpu.memory_space<vmem>>, vector<1x8xf32>
    %4 = vector.broadcast %3 : vector<1x8xf32> to vector<256x8xf32>
    %5 = arith.addf %2, %4 : vector<256x8xf32>
    %cst_5 = arith.constant 0.000000e+00 : f32
    %6 = vector.broadcast %cst_5 : f32 to vector<256x8xf32>
    %7 = arith.maximumf %5, %6 : vector<256x8xf32>
    %c0_6 = arith.constant 0 : index
    %c0_7 = arith.constant 0 : index
    %8 = vector.load %arg4[%c0_6, %c0_7] : memref<256x8xf32, #tpu.memory_space<vmem>>, vector<256x8xf32>
    tpu.vector_store %arg4[%c0_6, %c0_7], %7 {strides = array<i32>} : memref<256x8xf32, #tpu.memory_space<vmem>>, vector<256x8xf32>,
    return
  }
  func.func @transform_0(%arg0: i32) -> (i32, i32) {
    %c0_i32 = arith.constant 0 : i32
    %c0_i32_0 = arith.constant 0 : i32
    return %arg0, %c0_i32 : i32, i32
  }
  func.func @transform_1(%arg0: i32) -> (i32, i32) {
    %c0_i32 = arith.constant 0 : i32
    %c0_i32_0 = arith.constant 0 : i32
    %c0_i32_1 = arith.constant 0 : i32
    return %c0_i32, %c0_i32_0 : i32, i32
  }
  func.func @transform_2(%arg0: i32) -> (i32, i32) {
    %c0_i32 = arith.constant 0 : i32
    %c0_i32_0 = arith.constant 0 : i32
    %c0_i32_1 = arith.constant 0 : i32
    return %c0_i32, %c0_i32_0 : i32, i32
  }
  func.func @transform_3(%arg0: i32) -> (i32, i32) {
    %c0_i32 = arith.constant 0 : i32
    %c0_i32_0 = arith.constant 0 : i32
    return %arg0, %c0_i32 : i32, i32
  }
}

module attributes {stable_mosaic.version = 11 : i64} {
  func.func @_max_reduce_kernel(%arg0: memref<9x16x128xf32, #tpu.memory_space<vmem>>, %arg1: memref<16x128xf32, #tpu.memory_space<vmem>>) attributes {dimension_semantics = [], scalar_prefetch = 0 : i64, scratch_operands = 0 : i64, tpu.core_type = #tpu.core_type<tc>} {
    %c0 = arith.constant 0 : index
    %c0_0 = arith.constant 0 : index
    %c0_1 = arith.constant 0 : index
    %0 = vector.load %arg0[%c0, %c0_0, %c0_1] : memref<9x16x128xf32, #tpu.memory_space<vmem>>, vector<9x16x128xf32>
    %cst = arith.constant dense<0xFF800000> : vector<16x128xf32>
    %1 = vector.multi_reduction <maximumf>, %0, %cst [0] : vector<9x16x128xf32> to vector<16x128xf32>
    %c0_2 = arith.constant 0 : index
    %c0_3 = arith.constant 0 : index
    %2 = vector.load %arg1[%c0_2, %c0_3] : memref<16x128xf32, #tpu.memory_space<vmem>>, vector<16x128xf32>
    tpu.vector_store %arg1[%c0_2, %c0_3], %1 {strides = array<i32>} : memref<16x128xf32, #tpu.memory_space<vmem>>, vector<16x128xf32>,
    return
  }
}

module attributes {stable_mosaic.version = 11 : i64} {
  func.func @_mm_kernel(%arg0: i32, %arg1: memref<128x16xbf16, #tpu.memory_space<vmem>>, %arg2: memref<16x4xbf16, #tpu.memory_space<vmem>>, %arg3: memref<1x4xf32, #tpu.memory_space<vmem>>, %arg4: memref<128x4xf32, #tpu.memory_space<vmem>>) attributes {dimension_semantics = [#tpu.dimension_semantics<parallel>], iteration_bounds = array<i64: 1>, scalar_prefetch = 0 : i64, scratch_operands = 0 : i64, tpu.core_type = #tpu.core_type<tc>, window_params = [{transform_indices = @transform_0, window_bounds = array<i64: 128, 16>}, {pipeline_mode = #tpu.pipeline_mode<synchronous>, transform_indices = @transform_1, window_bounds = array<i64: 16, 4>}, {pipeline_mode = #tpu.pipeline_mode<synchronous>, transform_indices = @transform_2, window_bounds = array<i64: 1, 4>}, {transform_indices = @transform_3, window_bounds = array<i64: 128, 4>}]} {
    %c0 = arith.constant 0 : index
    %c0_0 = arith.constant 0 : index
    %0 = vector.load %arg1[%c0, %c0_0] : memref<128x16xbf16, #tpu.memory_space<vmem>>, vector<128x16xbf16>
    %c0_1 = arith.constant 0 : index
    %c0_2 = arith.constant 0 : index
    %1 = vector.load %arg2[%c0_1, %c0_2] : memref<16x4xbf16, #tpu.memory_space<vmem>>, vector<16x4xbf16>
    %cst = arith.constant dense<0.000000e+00> : vector<128x4xf32>
    %2 = tpu.matmul %0, %1, %cst {dimension_numbers = #tpu.dot_dimension_numbers<[1], [0], [0], [1], [0, 0, 1, 1], [], []>} : vector<128x16xbf16>, vector<16x4xbf16>, vector<128x4xf32> -> vector<128x4xf32>
    %c0_3 = arith.constant 0 : index
    %c0_4 = arith.constant 0 : index
    %3 = vector.load %arg3[%c0_3, %c0_4] : memref<1x4xf32, #tpu.memory_space<vmem>>, vector<1x4xf32>
    %4 = vector.broadcast %3 : vector<1x4xf32> to vector<128x4xf32>
    %5 = arith.addf %2, %4 : vector<128x4xf32>
    %cst_5 = arith.constant 0.000000e+00 : f32
    %6 = vector.broadcast %cst_5 : f32 to vector<128x4xf32>
    %7 = arith.maximumf %5, %6 : vector<128x4xf32>
    %c0_6 = arith.constant 0 : index
    %c0_7 = arith.constant 0 : index
    %8 = vector.load %arg4[%c0_6, %c0_7] : memref<128x4xf32, #tpu.memory_space<vmem>>, vector<128x4xf32>
    tpu.vector_store %arg4[%c0_6, %c0_7], %7 {strides = array<i32>} : memref<128x4xf32, #tpu.memory_space<vmem>>, vector<128x4xf32>,
    return
  }
  func.func @transform_0(%arg0: i32) -> (i32, i32) {
    %c0_i32 = arith.constant 0 : i32
    %c0_i32_0 = arith.constant 0 : i32
    return %arg0, %c0_i32 : i32, i32
  }
  func.func @transform_1(%arg0: i32) -> (i32, i32) {
    %c0_i32 = arith.constant 0 : i32
    %c0_i32_0 = arith.constant 0 : i32
    %c0_i32_1 = arith.constant 0 : i32
    return %c0_i32, %c0_i32_0 : i32, i32
  }
  func.func @transform_2(%arg0: i32) -> (i32, i32) {
    %c0_i32 = arith.constant 0 : i32
    %c0_i32_0 = arith.constant 0 : i32
    %c0_i32_1 = arith.constant 0 : i32
    return %c0_i32, %c0_i32_0 : i32, i32
  }
  func.func @transform_3(%arg0: i32) -> (i32, i32) {
    %c0_i32 = arith.constant 0 : i32
    %c0_i32_0 = arith.constant 0 : i32
    return %arg0, %c0_i32 : i32, i32
  }
}

module attributes {stable_mosaic.version = 11 : i64} {
  func.func @_mm_res_kernel(%arg0: i32, %arg1: memref<128x4xbf16, #tpu.memory_space<vmem>>, %arg2: memref<4x16xbf16, #tpu.memory_space<vmem>>, %arg3: memref<1x16xf32, #tpu.memory_space<vmem>>, %arg4: memref<128x16xf32, #tpu.memory_space<vmem>>, %arg5: memref<128x16xf32, #tpu.memory_space<vmem>>) attributes {dimension_semantics = [#tpu.dimension_semantics<parallel>], iteration_bounds = array<i64: 1>, scalar_prefetch = 0 : i64, scratch_operands = 0 : i64, tpu.core_type = #tpu.core_type<tc>, window_params = [{transform_indices = @transform_0, window_bounds = array<i64: 128, 4>}, {pipeline_mode = #tpu.pipeline_mode<synchronous>, transform_indices = @transform_1, window_bounds = array<i64: 4, 16>}, {pipeline_mode = #tpu.pipeline_mode<synchronous>, transform_indices = @transform_2, window_bounds = array<i64: 1, 16>}, {transform_indices = @transform_3, window_bounds = array<i64: 128, 16>}, {transform_indices = @transform_4, window_bounds = array<i64: 128, 16>}]} {
    %c0 = arith.constant 0 : index
    %c0_0 = arith.constant 0 : index
    %0 = vector.load %arg1[%c0, %c0_0] : memref<128x4xbf16, #tpu.memory_space<vmem>>, vector<128x4xbf16>
    %c0_1 = arith.constant 0 : index
    %c0_2 = arith.constant 0 : index
    %1 = vector.load %arg2[%c0_1, %c0_2] : memref<4x16xbf16, #tpu.memory_space<vmem>>, vector<4x16xbf16>
    %cst = arith.constant dense<0.000000e+00> : vector<128x16xf32>
    %2 = tpu.matmul %0, %1, %cst {dimension_numbers = #tpu.dot_dimension_numbers<[1], [0], [0], [1], [0, 0, 1, 1], [], []>} : vector<128x4xbf16>, vector<4x16xbf16>, vector<128x16xf32> -> vector<128x16xf32>
    %c0_3 = arith.constant 0 : index
    %c0_4 = arith.constant 0 : index
    %3 = vector.load %arg3[%c0_3, %c0_4] : memref<1x16xf32, #tpu.memory_space<vmem>>, vector<1x16xf32>
    %4 = vector.broadcast %3 : vector<1x16xf32> to vector<128x16xf32>
    %5 = arith.addf %2, %4 : vector<128x16xf32>
    %c0_5 = arith.constant 0 : index
    %c0_6 = arith.constant 0 : index
    %6 = vector.load %arg4[%c0_5, %c0_6] : memref<128x16xf32, #tpu.memory_space<vmem>>, vector<128x16xf32>
    %7 = arith.addf %5, %6 : vector<128x16xf32>
    %cst_7 = arith.constant 0.000000e+00 : f32
    %8 = vector.broadcast %cst_7 : f32 to vector<128x16xf32>
    %9 = arith.maximumf %7, %8 : vector<128x16xf32>
    %c0_8 = arith.constant 0 : index
    %c0_9 = arith.constant 0 : index
    %10 = vector.load %arg5[%c0_8, %c0_9] : memref<128x16xf32, #tpu.memory_space<vmem>>, vector<128x16xf32>
    tpu.vector_store %arg5[%c0_8, %c0_9], %9 {strides = array<i32>} : memref<128x16xf32, #tpu.memory_space<vmem>>, vector<128x16xf32>,
    return
  }
  func.func @transform_0(%arg0: i32) -> (i32, i32) {
    %c0_i32 = arith.constant 0 : i32
    %c0_i32_0 = arith.constant 0 : i32
    return %arg0, %c0_i32 : i32, i32
  }
  func.func @transform_1(%arg0: i32) -> (i32, i32) {
    %c0_i32 = arith.constant 0 : i32
    %c0_i32_0 = arith.constant 0 : i32
    %c0_i32_1 = arith.constant 0 : i32
    return %c0_i32, %c0_i32_0 : i32, i32
  }
  func.func @transform_2(%arg0: i32) -> (i32, i32) {
    %c0_i32 = arith.constant 0 : i32
    %c0_i32_0 = arith.constant 0 : i32
    %c0_i32_1 = arith.constant 0 : i32
    return %c0_i32, %c0_i32_0 : i32, i32
  }
  func.func @transform_3(%arg0: i32) -> (i32, i32) {
    %c0_i32 = arith.constant 0 : i32
    %c0_i32_0 = arith.constant 0 : i32
    return %arg0, %c0_i32 : i32, i32
  }
  func.func @transform_4(%arg0: i32) -> (i32, i32) {
    %c0_i32 = arith.constant 0 : i32
    %c0_i32_0 = arith.constant 0 : i32
    return %arg0, %c0_i32 : i32, i32
  }
}

module attributes {stable_mosaic.version = 11 : i64} {
  func.func @_mm_kernel(%arg0: i32, %arg1: memref<128x36xbf16, #tpu.memory_space<vmem>>, %arg2: memref<36x4xbf16, #tpu.memory_space<vmem>>, %arg3: memref<1x4xf32, #tpu.memory_space<vmem>>, %arg4: memref<128x4xf32, #tpu.memory_space<vmem>>) attributes {dimension_semantics = [#tpu.dimension_semantics<parallel>], iteration_bounds = array<i64: 1>, scalar_prefetch = 0 : i64, scratch_operands = 0 : i64, tpu.core_type = #tpu.core_type<tc>, window_params = [{transform_indices = @transform_0, window_bounds = array<i64: 128, 36>}, {pipeline_mode = #tpu.pipeline_mode<synchronous>, transform_indices = @transform_1, window_bounds = array<i64: 36, 4>}, {pipeline_mode = #tpu.pipeline_mode<synchronous>, transform_indices = @transform_2, window_bounds = array<i64: 1, 4>}, {transform_indices = @transform_3, window_bounds = array<i64: 128, 4>}]} {
    %c0 = arith.constant 0 : index
    %c0_0 = arith.constant 0 : index
    %0 = vector.load %arg1[%c0, %c0_0] : memref<128x36xbf16, #tpu.memory_space<vmem>>, vector<128x36xbf16>
    %c0_1 = arith.constant 0 : index
    %c0_2 = arith.constant 0 : index
    %1 = vector.load %arg2[%c0_1, %c0_2] : memref<36x4xbf16, #tpu.memory_space<vmem>>, vector<36x4xbf16>
    %cst = arith.constant dense<0.000000e+00> : vector<128x4xf32>
    %2 = tpu.matmul %0, %1, %cst {dimension_numbers = #tpu.dot_dimension_numbers<[1], [0], [0], [1], [0, 0, 1, 1], [], []>} : vector<128x36xbf16>, vector<36x4xbf16>, vector<128x4xf32> -> vector<128x4xf32>
    %c0_3 = arith.constant 0 : index
    %c0_4 = arith.constant 0 : index
    %3 = vector.load %arg3[%c0_3, %c0_4] : memref<1x4xf32, #tpu.memory_space<vmem>>, vector<1x4xf32>
    %4 = vector.broadcast %3 : vector<1x4xf32> to vector<128x4xf32>
    %5 = arith.addf %2, %4 : vector<128x4xf32>
    %cst_5 = arith.constant 0.000000e+00 : f32
    %6 = vector.broadcast %cst_5 : f32 to vector<128x4xf32>
    %7 = arith.maximumf %5, %6 : vector<128x4xf32>
    %c0_6 = arith.constant 0 : index
    %c0_7 = arith.constant 0 : index
    %8 = vector.load %arg4[%c0_6, %c0_7] : memref<128x4xf32, #tpu.memory_space<vmem>>, vector<128x4xf32>
    tpu.vector_store %arg4[%c0_6, %c0_7], %7 {strides = array<i32>} : memref<128x4xf32, #tpu.memory_space<vmem>>, vector<128x4xf32>,
    return
  }
  func.func @transform_0(%arg0: i32) -> (i32, i32) {
    %c0_i32 = arith.constant 0 : i32
    %c0_i32_0 = arith.constant 0 : i32
    return %arg0, %c0_i32 : i32, i32
  }
  func.func @transform_1(%arg0: i32) -> (i32, i32) {
    %c0_i32 = arith.constant 0 : i32
    %c0_i32_0 = arith.constant 0 : i32
    %c0_i32_1 = arith.constant 0 : i32
    return %c0_i32, %c0_i32_0 : i32, i32
  }
  func.func @transform_2(%arg0: i32) -> (i32, i32) {
    %c0_i32 = arith.constant 0 : i32
    %c0_i32_0 = arith.constant 0 : i32
    %c0_i32_1 = arith.constant 0 : i32
    return %c0_i32, %c0_i32_0 : i32, i32
  }
  func.func @transform_3(%arg0: i32) -> (i32, i32) {
    %c0_i32 = arith.constant 0 : i32
    %c0_i32_0 = arith.constant 0 : i32
    return %arg0, %c0_i32 : i32, i32
  }
}

module attributes {stable_mosaic.version = 11 : i64} {
  func.func @_mm_kernel(%arg0: i32, %arg1: memref<32x64xbf16, #tpu.memory_space<vmem>>, %arg2: memref<64x32xbf16, #tpu.memory_space<vmem>>, %arg3: memref<1x32xf32, #tpu.memory_space<vmem>>, %arg4: memref<32x32xf32, #tpu.memory_space<vmem>>) attributes {dimension_semantics = [#tpu.dimension_semantics<parallel>], iteration_bounds = array<i64: 1>, scalar_prefetch = 0 : i64, scratch_operands = 0 : i64, tpu.core_type = #tpu.core_type<tc>, window_params = [{transform_indices = @transform_0, window_bounds = array<i64: 32, 64>}, {pipeline_mode = #tpu.pipeline_mode<synchronous>, transform_indices = @transform_1, window_bounds = array<i64: 64, 32>}, {pipeline_mode = #tpu.pipeline_mode<synchronous>, transform_indices = @transform_2, window_bounds = array<i64: 1, 32>}, {transform_indices = @transform_3, window_bounds = array<i64: 32, 32>}]} {
    %c0 = arith.constant 0 : index
    %c0_0 = arith.constant 0 : index
    %0 = vector.load %arg1[%c0, %c0_0] : memref<32x64xbf16, #tpu.memory_space<vmem>>, vector<32x64xbf16>
    %c0_1 = arith.constant 0 : index
    %c0_2 = arith.constant 0 : index
    %1 = vector.load %arg2[%c0_1, %c0_2] : memref<64x32xbf16, #tpu.memory_space<vmem>>, vector<64x32xbf16>
    %cst = arith.constant dense<0.000000e+00> : vector<32x32xf32>
    %2 = tpu.matmul %0, %1, %cst {dimension_numbers = #tpu.dot_dimension_numbers<[1], [0], [0], [1], [0, 0, 1, 1], [], []>} : vector<32x64xbf16>, vector<64x32xbf16>, vector<32x32xf32> -> vector<32x32xf32>
    %c0_3 = arith.constant 0 : index
    %c0_4 = arith.constant 0 : index
    %3 = vector.load %arg3[%c0_3, %c0_4] : memref<1x32xf32, #tpu.memory_space<vmem>>, vector<1x32xf32>
    %4 = vector.broadcast %3 : vector<1x32xf32> to vector<32x32xf32>
    %5 = arith.addf %2, %4 : vector<32x32xf32>
    %c0_5 = arith.constant 0 : index
    %c0_6 = arith.constant 0 : index
    %6 = vector.load %arg4[%c0_5, %c0_6] : memref<32x32xf32, #tpu.memory_space<vmem>>, vector<32x32xf32>
    tpu.vector_store %arg4[%c0_5, %c0_6], %5 {strides = array<i32>} : memref<32x32xf32, #tpu.memory_space<vmem>>, vector<32x32xf32>,
    return
  }
  func.func @transform_0(%arg0: i32) -> (i32, i32) {
    %c0_i32 = arith.constant 0 : i32
    %c0_i32_0 = arith.constant 0 : i32
    return %arg0, %c0_i32 : i32, i32
  }
  func.func @transform_1(%arg0: i32) -> (i32, i32) {
    %c0_i32 = arith.constant 0 : i32
    %c0_i32_0 = arith.constant 0 : i32
    %c0_i32_1 = arith.constant 0 : i32
    return %c0_i32, %c0_i32_0 : i32, i32
  }
  func.func @transform_2(%arg0: i32) -> (i32, i32) {
    %c0_i32 = arith.constant 0 : i32
    %c0_i32_0 = arith.constant 0 : i32
    %c0_i32_1 = arith.constant 0 : i32
    return %c0_i32, %c0_i32_0 : i32, i32
  }
  func.func @transform_3(%arg0: i32) -> (i32, i32) {
    %c0_i32 = arith.constant 0 : i32
    %c0_i32_0 = arith.constant 0 : i32
    return %arg0, %c0_i32 : i32, i32
  }
}

module attributes {stable_mosaic.version = 11 : i64} {
  func.func @_mm_kernel(%arg0: i32, %arg1: memref<128x16xbf16, #tpu.memory_space<vmem>>, %arg2: memref<16x8xbf16, #tpu.memory_space<vmem>>, %arg3: memref<1x8xf32, #tpu.memory_space<vmem>>, %arg4: memref<128x8xf32, #tpu.memory_space<vmem>>) attributes {dimension_semantics = [#tpu.dimension_semantics<parallel>], iteration_bounds = array<i64: 1>, scalar_prefetch = 0 : i64, scratch_operands = 0 : i64, tpu.core_type = #tpu.core_type<tc>, window_params = [{transform_indices = @transform_0, window_bounds = array<i64: 128, 16>}, {pipeline_mode = #tpu.pipeline_mode<synchronous>, transform_indices = @transform_1, window_bounds = array<i64: 16, 8>}, {pipeline_mode = #tpu.pipeline_mode<synchronous>, transform_indices = @transform_2, window_bounds = array<i64: 1, 8>}, {transform_indices = @transform_3, window_bounds = array<i64: 128, 8>}]} {
    %c0 = arith.constant 0 : index
    %c0_0 = arith.constant 0 : index
    %0 = vector.load %arg1[%c0, %c0_0] : memref<128x16xbf16, #tpu.memory_space<vmem>>, vector<128x16xbf16>
    %c0_1 = arith.constant 0 : index
    %c0_2 = arith.constant 0 : index
    %1 = vector.load %arg2[%c0_1, %c0_2] : memref<16x8xbf16, #tpu.memory_space<vmem>>, vector<16x8xbf16>
    %cst = arith.constant dense<0.000000e+00> : vector<128x8xf32>
    %2 = tpu.matmul %0, %1, %cst {dimension_numbers = #tpu.dot_dimension_numbers<[1], [0], [0], [1], [0, 0, 1, 1], [], []>} : vector<128x16xbf16>, vector<16x8xbf16>, vector<128x8xf32> -> vector<128x8xf32>
    %c0_3 = arith.constant 0 : index
    %c0_4 = arith.constant 0 : index
    %3 = vector.load %arg3[%c0_3, %c0_4] : memref<1x8xf32, #tpu.memory_space<vmem>>, vector<1x8xf32>
    %4 = vector.broadcast %3 : vector<1x8xf32> to vector<128x8xf32>
    %5 = arith.addf %2, %4 : vector<128x8xf32>
    %cst_5 = arith.constant 0.000000e+00 : f32
    %6 = vector.broadcast %cst_5 : f32 to vector<128x8xf32>
    %7 = arith.maximumf %5, %6 : vector<128x8xf32>
    %c0_6 = arith.constant 0 : index
    %c0_7 = arith.constant 0 : index
    %8 = vector.load %arg4[%c0_6, %c0_7] : memref<128x8xf32, #tpu.memory_space<vmem>>, vector<128x8xf32>
    tpu.vector_store %arg4[%c0_6, %c0_7], %7 {strides = array<i32>} : memref<128x8xf32, #tpu.memory_space<vmem>>, vector<128x8xf32>,
    return
  }
  func.func @transform_0(%arg0: i32) -> (i32, i32) {
    %c0_i32 = arith.constant 0 : i32
    %c0_i32_0 = arith.constant 0 : i32
    return %arg0, %c0_i32 : i32, i32
  }
  func.func @transform_1(%arg0: i32) -> (i32, i32) {
    %c0_i32 = arith.constant 0 : i32
    %c0_i32_0 = arith.constant 0 : i32
    %c0_i32_1 = arith.constant 0 : i32
    return %c0_i32, %c0_i32_0 : i32, i32
  }
  func.func @transform_2(%arg0: i32) -> (i32, i32) {
    %c0_i32 = arith.constant 0 : i32
    %c0_i32_0 = arith.constant 0 : i32
    %c0_i32_1 = arith.constant 0 : i32
    return %c0_i32, %c0_i32_0 : i32, i32
  }
  func.func @transform_3(%arg0: i32) -> (i32, i32) {
    %c0_i32 = arith.constant 0 : i32
    %c0_i32_0 = arith.constant 0 : i32
    return %arg0, %c0_i32 : i32, i32
  }
}

module attributes {stable_mosaic.version = 11 : i64} {
  func.func @_mm_kernel(%arg0: i32, %arg1: memref<32x72xbf16, #tpu.memory_space<vmem>>, %arg2: memref<72x8xbf16, #tpu.memory_space<vmem>>, %arg3: memref<1x8xf32, #tpu.memory_space<vmem>>, %arg4: memref<32x8xf32, #tpu.memory_space<vmem>>) attributes {dimension_semantics = [#tpu.dimension_semantics<parallel>], iteration_bounds = array<i64: 1>, scalar_prefetch = 0 : i64, scratch_operands = 0 : i64, tpu.core_type = #tpu.core_type<tc>, window_params = [{transform_indices = @transform_0, window_bounds = array<i64: 32, 72>}, {pipeline_mode = #tpu.pipeline_mode<synchronous>, transform_indices = @transform_1, window_bounds = array<i64: 72, 8>}, {pipeline_mode = #tpu.pipeline_mode<synchronous>, transform_indices = @transform_2, window_bounds = array<i64: 1, 8>}, {transform_indices = @transform_3, window_bounds = array<i64: 32, 8>}]} {
    %c0 = arith.constant 0 : index
    %c0_0 = arith.constant 0 : index
    %0 = vector.load %arg1[%c0, %c0_0] : memref<32x72xbf16, #tpu.memory_space<vmem>>, vector<32x72xbf16>
    %c0_1 = arith.constant 0 : index
    %c0_2 = arith.constant 0 : index
    %1 = vector.load %arg2[%c0_1, %c0_2] : memref<72x8xbf16, #tpu.memory_space<vmem>>, vector<72x8xbf16>
    %cst = arith.constant dense<0.000000e+00> : vector<32x8xf32>
    %2 = tpu.matmul %0, %1, %cst {dimension_numbers = #tpu.dot_dimension_numbers<[1], [0], [0], [1], [0, 0, 1, 1], [], []>} : vector<32x72xbf16>, vector<72x8xbf16>, vector<32x8xf32> -> vector<32x8xf32>
    %c0_3 = arith.constant 0 : index
    %c0_4 = arith.constant 0 : index
    %3 = vector.load %arg3[%c0_3, %c0_4] : memref<1x8xf32, #tpu.memory_space<vmem>>, vector<1x8xf32>
    %4 = vector.broadcast %3 : vector<1x8xf32> to vector<32x8xf32>
    %5 = arith.addf %2, %4 : vector<32x8xf32>
    %cst_5 = arith.constant 0.000000e+00 : f32
    %6 = vector.broadcast %cst_5 : f32 to vector<32x8xf32>
    %7 = arith.maximumf %5, %6 : vector<32x8xf32>
    %c0_6 = arith.constant 0 : index
    %c0_7 = arith.constant 0 : index
    %8 = vector.load %arg4[%c0_6, %c0_7] : memref<32x8xf32, #tpu.memory_space<vmem>>, vector<32x8xf32>
    tpu.vector_store %arg4[%c0_6, %c0_7], %7 {strides = array<i32>} : memref<32x8xf32, #tpu.memory_space<vmem>>, vector<32x8xf32>,
    return
  }
  func.func @transform_0(%arg0: i32) -> (i32, i32) {
    %c0_i32 = arith.constant 0 : i32
    %c0_i32_0 = arith.constant 0 : i32
    return %arg0, %c0_i32 : i32, i32
  }
  func.func @transform_1(%arg0: i32) -> (i32, i32) {
    %c0_i32 = arith.constant 0 : i32
    %c0_i32_0 = arith.constant 0 : i32
    %c0_i32_1 = arith.constant 0 : i32
    return %c0_i32, %c0_i32_0 : i32, i32
  }
  func.func @transform_2(%arg0: i32) -> (i32, i32) {
    %c0_i32 = arith.constant 0 : i32
    %c0_i32_0 = arith.constant 0 : i32
    %c0_i32_1 = arith.constant 0 : i32
    return %c0_i32, %c0_i32_0 : i32, i32
  }
  func.func @transform_3(%arg0: i32) -> (i32, i32) {
    %c0_i32 = arith.constant 0 : i32
    %c0_i32_0 = arith.constant 0 : i32
    return %arg0, %c0_i32 : i32, i32
  }
}

module attributes {stable_mosaic.version = 11 : i64} {
  func.func @_mm_res_kernel(%arg0: i32, %arg1: memref<32x8xbf16, #tpu.memory_space<vmem>>, %arg2: memref<8x32xbf16, #tpu.memory_space<vmem>>, %arg3: memref<1x32xf32, #tpu.memory_space<vmem>>, %arg4: memref<32x32xf32, #tpu.memory_space<vmem>>, %arg5: memref<32x32xf32, #tpu.memory_space<vmem>>) attributes {dimension_semantics = [#tpu.dimension_semantics<parallel>], iteration_bounds = array<i64: 1>, scalar_prefetch = 0 : i64, scratch_operands = 0 : i64, tpu.core_type = #tpu.core_type<tc>, window_params = [{transform_indices = @transform_0, window_bounds = array<i64: 32, 8>}, {pipeline_mode = #tpu.pipeline_mode<synchronous>, transform_indices = @transform_1, window_bounds = array<i64: 8, 32>}, {pipeline_mode = #tpu.pipeline_mode<synchronous>, transform_indices = @transform_2, window_bounds = array<i64: 1, 32>}, {transform_indices = @transform_3, window_bounds = array<i64: 32, 32>}, {transform_indices = @transform_4, window_bounds = array<i64: 32, 32>}]} {
    %c0 = arith.constant 0 : index
    %c0_0 = arith.constant 0 : index
    %0 = vector.load %arg1[%c0, %c0_0] : memref<32x8xbf16, #tpu.memory_space<vmem>>, vector<32x8xbf16>
    %c0_1 = arith.constant 0 : index
    %c0_2 = arith.constant 0 : index
    %1 = vector.load %arg2[%c0_1, %c0_2] : memref<8x32xbf16, #tpu.memory_space<vmem>>, vector<8x32xbf16>
    %cst = arith.constant dense<0.000000e+00> : vector<32x32xf32>
    %2 = tpu.matmul %0, %1, %cst {dimension_numbers = #tpu.dot_dimension_numbers<[1], [0], [0], [1], [0, 0, 1, 1], [], []>} : vector<32x8xbf16>, vector<8x32xbf16>, vector<32x32xf32> -> vector<32x32xf32>
    %c0_3 = arith.constant 0 : index
    %c0_4 = arith.constant 0 : index
    %3 = vector.load %arg3[%c0_3, %c0_4] : memref<1x32xf32, #tpu.memory_space<vmem>>, vector<1x32xf32>
    %4 = vector.broadcast %3 : vector<1x32xf32> to vector<32x32xf32>
    %5 = arith.addf %2, %4 : vector<32x32xf32>
    %c0_5 = arith.constant 0 : index
    %c0_6 = arith.constant 0 : index
    %6 = vector.load %arg4[%c0_5, %c0_6] : memref<32x32xf32, #tpu.memory_space<vmem>>, vector<32x32xf32>
    %7 = arith.addf %5, %6 : vector<32x32xf32>
    %cst_7 = arith.constant 0.000000e+00 : f32
    %8 = vector.broadcast %cst_7 : f32 to vector<32x32xf32>
    %9 = arith.maximumf %7, %8 : vector<32x32xf32>
    %c0_8 = arith.constant 0 : index
    %c0_9 = arith.constant 0 : index
    %10 = vector.load %arg5[%c0_8, %c0_9] : memref<32x32xf32, #tpu.memory_space<vmem>>, vector<32x32xf32>
    tpu.vector_store %arg5[%c0_8, %c0_9], %9 {strides = array<i32>} : memref<32x32xf32, #tpu.memory_space<vmem>>, vector<32x32xf32>,
    return
  }
  func.func @transform_0(%arg0: i32) -> (i32, i32) {
    %c0_i32 = arith.constant 0 : i32
    %c0_i32_0 = arith.constant 0 : i32
    return %arg0, %c0_i32 : i32, i32
  }
  func.func @transform_1(%arg0: i32) -> (i32, i32) {
    %c0_i32 = arith.constant 0 : i32
    %c0_i32_0 = arith.constant 0 : i32
    %c0_i32_1 = arith.constant 0 : i32
    return %c0_i32, %c0_i32_0 : i32, i32
  }
  func.func @transform_2(%arg0: i32) -> (i32, i32) {
    %c0_i32 = arith.constant 0 : i32
    %c0_i32_0 = arith.constant 0 : i32
    %c0_i32_1 = arith.constant 0 : i32
    return %c0_i32, %c0_i32_0 : i32, i32
  }
  func.func @transform_3(%arg0: i32) -> (i32, i32) {
    %c0_i32 = arith.constant 0 : i32
    %c0_i32_0 = arith.constant 0 : i32
    return %arg0, %c0_i32 : i32, i32
  }
  func.func @transform_4(%arg0: i32) -> (i32, i32) {
    %c0_i32 = arith.constant 0 : i32
    %c0_i32_0 = arith.constant 0 : i32
    return %arg0, %c0_i32 : i32, i32
  }
}

module attributes {stable_mosaic.version = 11 : i64} {
  func.func @_mm_kernel(%arg0: i32, %arg1: memref<32x32xbf16, #tpu.memory_space<vmem>>, %arg2: memref<32x8xbf16, #tpu.memory_space<vmem>>, %arg3: memref<1x8xf32, #tpu.memory_space<vmem>>, %arg4: memref<32x8xf32, #tpu.memory_space<vmem>>) attributes {dimension_semantics = [#tpu.dimension_semantics<parallel>], iteration_bounds = array<i64: 1>, scalar_prefetch = 0 : i64, scratch_operands = 0 : i64, tpu.core_type = #tpu.core_type<tc>, window_params = [{transform_indices = @transform_0, window_bounds = array<i64: 32, 32>}, {pipeline_mode = #tpu.pipeline_mode<synchronous>, transform_indices = @transform_1, window_bounds = array<i64: 32, 8>}, {pipeline_mode = #tpu.pipeline_mode<synchronous>, transform_indices = @transform_2, window_bounds = array<i64: 1, 8>}, {transform_indices = @transform_3, window_bounds = array<i64: 32, 8>}]} {
    %c0 = arith.constant 0 : index
    %c0_0 = arith.constant 0 : index
    %0 = vector.load %arg1[%c0, %c0_0] : memref<32x32xbf16, #tpu.memory_space<vmem>>, vector<32x32xbf16>
    %c0_1 = arith.constant 0 : index
    %c0_2 = arith.constant 0 : index
    %1 = vector.load %arg2[%c0_1, %c0_2] : memref<32x8xbf16, #tpu.memory_space<vmem>>, vector<32x8xbf16>
    %cst = arith.constant dense<0.000000e+00> : vector<32x8xf32>
    %2 = tpu.matmul %0, %1, %cst {dimension_numbers = #tpu.dot_dimension_numbers<[1], [0], [0], [1], [0, 0, 1, 1], [], []>} : vector<32x32xbf16>, vector<32x8xbf16>, vector<32x8xf32> -> vector<32x8xf32>
    %c0_3 = arith.constant 0 : index
    %c0_4 = arith.constant 0 : index
    %3 = vector.load %arg3[%c0_3, %c0_4] : memref<1x8xf32, #tpu.memory_space<vmem>>, vector<1x8xf32>
    %4 = vector.broadcast %3 : vector<1x8xf32> to vector<32x8xf32>
    %5 = arith.addf %2, %4 : vector<32x8xf32>
    %cst_5 = arith.constant 0.000000e+00 : f32
    %6 = vector.broadcast %cst_5 : f32 to vector<32x8xf32>
    %7 = arith.maximumf %5, %6 : vector<32x8xf32>
    %c0_6 = arith.constant 0 : index
    %c0_7 = arith.constant 0 : index
    %8 = vector.load %arg4[%c0_6, %c0_7] : memref<32x8xf32, #tpu.memory_space<vmem>>, vector<32x8xf32>
    tpu.vector_store %arg4[%c0_6, %c0_7], %7 {strides = array<i32>} : memref<32x8xf32, #tpu.memory_space<vmem>>, vector<32x8xf32>,
    return
  }
  func.func @transform_0(%arg0: i32) -> (i32, i32) {
    %c0_i32 = arith.constant 0 : i32
    %c0_i32_0 = arith.constant 0 : i32
    return %arg0, %c0_i32 : i32, i32
  }
  func.func @transform_1(%arg0: i32) -> (i32, i32) {
    %c0_i32 = arith.constant 0 : i32
    %c0_i32_0 = arith.constant 0 : i32
    %c0_i32_1 = arith.constant 0 : i32
    return %c0_i32, %c0_i32_0 : i32, i32
  }
  func.func @transform_2(%arg0: i32) -> (i32, i32) {
    %c0_i32 = arith.constant 0 : i32
    %c0_i32_0 = arith.constant 0 : i32
    %c0_i32_1 = arith.constant 0 : i32
    return %c0_i32, %c0_i32_0 : i32, i32
  }
  func.func @transform_3(%arg0: i32) -> (i32, i32) {
    %c0_i32 = arith.constant 0 : i32
    %c0_i32_0 = arith.constant 0 : i32
    return %arg0, %c0_i32 : i32, i32
  }
}

module attributes {stable_mosaic.version = 11 : i64} {
  func.func @_mm_kernel(%arg0: i32, %arg1: memref<32x32xbf16, #tpu.memory_space<vmem>>, %arg2: memref<32x10xbf16, #tpu.memory_space<vmem>>, %arg3: memref<1x10xf32, #tpu.memory_space<vmem>>, %arg4: memref<32x10xf32, #tpu.memory_space<vmem>>) attributes {dimension_semantics = [#tpu.dimension_semantics<parallel>], iteration_bounds = array<i64: 1>, scalar_prefetch = 0 : i64, scratch_operands = 0 : i64, tpu.core_type = #tpu.core_type<tc>, window_params = [{transform_indices = @transform_0, window_bounds = array<i64: 32, 32>}, {pipeline_mode = #tpu.pipeline_mode<synchronous>, transform_indices = @transform_1, window_bounds = array<i64: 32, 10>}, {pipeline_mode = #tpu.pipeline_mode<synchronous>, transform_indices = @transform_2, window_bounds = array<i64: 1, 10>}, {transform_indices = @transform_3, window_bounds = array<i64: 32, 10>}]} {
    %c0 = arith.constant 0 : index
    %c0_0 = arith.constant 0 : index
    %0 = vector.load %arg1[%c0, %c0_0] : memref<32x32xbf16, #tpu.memory_space<vmem>>, vector<32x32xbf16>
    %c0_1 = arith.constant 0 : index
    %c0_2 = arith.constant 0 : index
    %1 = vector.load %arg2[%c0_1, %c0_2] : memref<32x10xbf16, #tpu.memory_space<vmem>>, vector<32x10xbf16>
    %cst = arith.constant dense<0.000000e+00> : vector<32x10xf32>
    %2 = tpu.matmul %0, %1, %cst {dimension_numbers = #tpu.dot_dimension_numbers<[1], [0], [0], [1], [0, 0, 1, 1], [], []>} : vector<32x32xbf16>, vector<32x10xbf16>, vector<32x10xf32> -> vector<32x10xf32>
    %c0_3 = arith.constant 0 : index
    %c0_4 = arith.constant 0 : index
    %3 = vector.load %arg3[%c0_3, %c0_4] : memref<1x10xf32, #tpu.memory_space<vmem>>, vector<1x10xf32>
    %4 = vector.broadcast %3 : vector<1x10xf32> to vector<32x10xf32>
    %5 = arith.addf %2, %4 : vector<32x10xf32>
    %c0_5 = arith.constant 0 : index
    %c0_6 = arith.constant 0 : index
    %6 = vector.load %arg4[%c0_5, %c0_6] : memref<32x10xf32, #tpu.memory_space<vmem>>, vector<32x10xf32>
    tpu.vector_store %arg4[%c0_5, %c0_6], %5 {strides = array<i32>} : memref<32x10xf32, #tpu.memory_space<vmem>>, vector<32x10xf32>,
    return
  }
  func.func @transform_0(%arg0: i32) -> (i32, i32) {
    %c0_i32 = arith.constant 0 : i32
    %c0_i32_0 = arith.constant 0 : i32
    return %arg0, %c0_i32 : i32, i32
  }
  func.func @transform_1(%arg0: i32) -> (i32, i32) {
    %c0_i32 = arith.constant 0 : i32
    %c0_i32_0 = arith.constant 0 : i32
    %c0_i32_1 = arith.constant 0 : i32
    return %c0_i32, %c0_i32_0 : i32, i32
  }
  func.func @transform_2(%arg0: i32) -> (i32, i32) {
    %c0_i32 = arith.constant 0 : i32
    %c0_i32_0 = arith.constant 0 : i32
    %c0_i32_1 = arith.constant 0 : i32
    return %c0_i32, %c0_i32_0 : i32, i32
  }
  func.func @transform_3(%arg0: i32) -> (i32, i32) {
    %c0_i32 = arith.constant 0 : i32
    %c0_i32_0 = arith.constant 0 : i32
    return %arg0, %c0_i32 : i32, i32
  }
}

</mosaic_0001>

<bundles_post_ra>
// kernel: resneta_forward.18
= control target key start
LH: loop header
LB: loop body
LE: loop exit
PB: predicated region body
PF: predicated region fallthrough
CT: control target
= control target key end

     0   :  { %s734_s12 = smov 0   ;;  %s901_s0 = inlined_call_operand.vmem [shape: bf16[512,27], index: 0, kind: input, shape index: {}]   ;;  %s902_s1 = inlined_call_operand.vmem [shape: bf16[27,8], index: 1, kind: input, shape index: {}]   ;;  %s903_s2 = inlined_call_operand.vmem [shape: f32[1,8], index: 2, kind: input, shape index: {}]   ;;  %s904_s3 = inlined_call_operand.vmem [shape: f32[512,8], index: 3, kind: output, shape index: {}]  }
   0x1 LB: > { %s572_s13 = sadd.s32 4294967295, %s711_s12   ;;  %p576_p0 = scmp.ge.s32.totalorder %s711_s12, 1  ;;  %s711_s12 = sphi %s734_s12, %s13_s12  }
   0x2   : > { %p138_p1 = scmp.lt.s32.totalorder %s711_s12, 3 }
   0x4   : > { %p139_p2 = pnand %p576_p0, %p138_p1 }
   0x5   : > { %s577_s18 = sshll.u32 (!%p139_p2), %s572_s13, 5 }
   0x6   : > { %142 = sbr.rel (%p139_p2) target bundleno = 219 (0xdb), region = 32  ;;  %p163_p3 = scmp.lt.s32.totalorder (!%p139_p2), %s577_s18, 63 }
   0xb   : > { %v651_v0 = vld [vmem:[%s902_s1 + $0x8] sm:$0xf]  ;;  %v688_v1 = vld [vmem:[%s902_s1 + $0x8] sm:$0x30]  ;;  %vm355_vm0 = vcmask 1044480   ;;  %vm356_vm1 = vcmask 1045504  }
   0xc   : > { %v652_v2 = vor.u32 %v688_v1, %v651_v0  ;;  %v713_v3 = vmov 65535   ;;  %s906_s18 = smov (!%p163_p3, %s577_s18), 63  ;;  %v687_v7 = vld [vmem:[%s902_s1] sm:$0xff]  ;;  %vm306_vm2 = vcmask 220160   ;;  %vm483_vm3 = vcmask 64512  }
   0xd   : > { %v357_v4 = vsel %vm355_vm0, 4294967295, %v713_v3  ;;  %s578_s21 = sshll.u32 %s906_s18, 2  ;;  %v794_v24 = vld [vmem:[%s903_s2] ss:$0 sm:$0xff]  ;;  %s580_s27 = sshll.u32 %s906_s18, 3 }
   0xe   : > { %v358_v5 = vsel %vm356_vm1, %v357_v4, 0  ;;  %s757_s24 = scalar_lea.vmem %s901_s0, %s578_s21  ;;  %s802_s30 = scalar_lea.vmem %s904_s3, %s580_s27 }
   0xf   : > { %v360_v6 = vand.u32 %v652_v2, %v358_v5  ;;  %v671_v8 = vld [vmem:[%s757_s24] sm:$0xff]  ;;  %v672_v12 = vld [vmem:[%s757_s24 + $0x8] sm:$0xff]  ;;  %v673_v16 = vld [vmem:[%s757_s24 + $0x10] sm:$0xff] }
  0x10   : > { %v675_v9 = vld [vmem:[%s757_s24 + $0x20] sm:$0xff]  ;;  %v676_v13 = vld [vmem:[%s757_s24 + $0x28] sm:$0xff]  ;;  %v677_v17 = vld [vmem:[%s757_s24 + $0x30] sm:$0xff] }
  0x11   : > { %368 = vmatpush.bf16.msra.mxu0 %v360_v6  ;;  %689 = vmatpush.bf16.msra.mxu1 %v360_v6  ;;  %v679_v10 = vld [vmem:[%s757_s24 + $0x40] sm:$0xff]  ;;  %v680_v14 = vld [vmem:[%s757_s24 + $0x48] sm:$0xff]  ;;  %v681_v18 = vld [vmem:[%s757_s24 + $0x50] sm:$0xff] }
  0x12   : > { %690 = vmatpush.bf16.msra.mxu2 %v360_v6  ;;  %691 = vmatpush.bf16.msra.mxu3 %v360_v6  ;;  %v683_v11 = vld [vmem:[%s757_s24 + $0x60] sm:$0xff]  ;;  %v684_v15 = vld [vmem:[%s757_s24 + $0x68] sm:$0xff]  ;;  %v685_v19 = vld [vmem:[%s757_s24 + $0x70] sm:$0xff] }
  0x13   : > { %v674_v20 = vld [vmem:[%s757_s24 + $0x18] sm:$0xff] }
  0x14   : > { %v678_v21 = vld [vmem:[%s757_s24 + $0x38] sm:$0xff] }
  0x15   : > { %369 = vmatpush.bf16.msra.mxu0 %v687_v7  ;;  %692 = vmatpush.bf16.msra.mxu1 %v687_v7  ;;  %v682_v22 = vld [vmem:[%s757_s24 + $0x58] sm:$0xff] }
  0x16   : > { %693 = vmatpush.bf16.msra.mxu2 %v687_v7  ;;  %694 = vmatpush.bf16.msra.mxu3 %v687_v7  ;;  %v686_v23 = vld [vmem:[%s757_s24 + $0x78] sm:$0xff] }
  0x18   : > { %653 = vmatmul.msk.bf16.vlgmr.msra.gmra.mxu0 %vm306_vm2, %v671_v8  ;;  %657 = vmatmul.msk.bf16.vlgmr.msra.gmra.mxu1 %vm306_vm2, %v675_v9 }
  0x19   : > { %661 = vmatmul.msk.bf16.vlgmr.msra.gmra.mxu2 %vm306_vm2, %v679_v10  ;;  %665 = vmatmul.msk.bf16.vlgmr.msra.gmra.mxu3 %vm306_vm2, %v683_v11 }
  0x28   : > { %654 = vmatmul.msk.bf16.gmra.mxu0 %vm306_vm2, %v672_v12  ;;  %658 = vmatmul.msk.bf16.gmra.mxu1 %vm306_vm2, %v676_v13 }
  0x29   : > { %662 = vmatmul.msk.bf16.gmra.mxu2 %vm306_vm2, %v680_v14  ;;  %666 = vmatmul.msk.bf16.gmra.mxu3 %vm306_vm2, %v684_v15 }
  0x38   : > { %655 = vmatmul.msk.bf16.gmra.mxu0 %vm306_vm2, %v673_v16  ;;  %659 = vmatmul.msk.bf16.gmra.mxu1 %vm306_vm2, %v677_v17 }
  0x39   : > { %663 = vmatmul.msk.bf16.gmra.mxu2 %vm306_vm2, %v681_v18  ;;  %667 = vmatmul.msk.bf16.gmra.mxu3 %vm306_vm2, %v685_v19 }
  0x48   : > { %656 = vmatmul.msk.bf16.gmra.mxu0 %vm306_vm2, %v674_v20  ;;  %660 = vmatmul.msk.bf16.gmra.mxu1 %vm306_vm2, %v678_v21 }
  0x49   : > { %664 = vmatmul.msk.bf16.gmra.mxu2 %vm306_vm2, %v682_v22  ;;  %668 = vmatmul.msk.bf16.gmra.mxu3 %vm306_vm2, %v686_v23 }
  0x95   : > { %v371_v25 = vpop.f32.mrf.mxu0  ;;  %v391_v26 = vpop.f32.mrf.mxu1 }
  0x96   : > { %v372_v27 = vadd.f32 %v794_v24, %v371_v25  ;;  %v392_v28 = vadd.f32 %v794_v24, %v391_v26 }
  0x98   : > { %v451_v29 = vmax.f32 %v372_v27, 0.0  ;;  %v459_v30 = vmax.f32 %v392_v28, 0.0 }
  0x9a   : > { %484 = vst.msk [vmem:[%s802_s30] sm:$0xff] %vm483_vm3, %v451_v29 }
  0x9b   : > { %492 = vst.msk [vmem:[%s802_s30 + $0x40] sm:$0xff] %vm483_vm3, %v459_v30 }
  0x9c   : > { %v411_v31 = vpop.f32.mrf.mxu2  ;;  %v431_v32 = vpop.f32.mrf.mxu3 }
  0x9d   : > { %v412_v33 = vadd.f32 %v794_v24, %v411_v31  ;;  %v432_v34 = vadd.f32 %v794_v24, %v431_v32  ;;  %v373_v35 = vpop.f32.mrf.mxu0  ;;  %v393_v36 = vpop.f32.mrf.mxu1 }
  0x9e   : > { %v374_v37 = vadd.f32 %v794_v24, %v373_v35  ;;  %v394_v38 = vadd.f32 %v794_v24, %v393_v36 }
  0x9f   : > { %v467_v39 = vmax.f32 %v412_v33, 0.0  ;;  %v475_v40 = vmax.f32 %v432_v34, 0.0 }
  0xa0   : > { %v452_v41 = vmax.f32 %v374_v37, 0.0  ;;  %v460_v42 = vmax.f32 %v394_v38, 0.0 }
  0xa1   : > { %500 = vst.msk [vmem:[%s802_s30 + $0x80] sm:$0xff] %vm483_vm3, %v467_v39 }
  0xa2   : > { %508 = vst.msk [vmem:[%s802_s30 + $0xc0] sm:$0xff] %vm483_vm3, %v475_v40 }
  0xa3   : > { %485 = vst.msk [vmem:[%s802_s30 + $0x8] sm:$0xff] %vm483_vm3, %v452_v41 }
  0xa4   : > { %493 = vst.msk [vmem:[%s802_s30 + $0x48] sm:$0xff] %vm483_vm3, %v460_v42  ;;  %v413_v43 = vpop.f32.mrf.mxu2  ;;  %v433_v44 = vpop.f32.mrf.mxu3 }
  0xa5   : > { %v414_v45 = vadd.f32 %v794_v24, %v413_v43  ;;  %v434_v46 = vadd.f32 %v794_v24, %v433_v44  ;;  %v376_v47 = vpop.f32.mrf.mxu0  ;;  %v396_v48 = vpop.f32.mrf.mxu1 }
  0xa6   : > { %v377_v49 = vadd.f32 %v794_v24, %v376_v47  ;;  %v397_v50 = vadd.f32 %v794_v24, %v396_v48 }
  0xa7   : > { %v468_v51 = vmax.f32 %v414_v45, 0.0  ;;  %v476_v52 = vmax.f32 %v434_v46, 0.0 }
  0xa8   : > { %v453_v53 = vmax.f32 %v377_v49, 0.0  ;;  %v461_v54 = vmax.f32 %v397_v50, 0.0 }
  0xa9   : > { %501 = vst.msk [vmem:[%s802_s30 + $0x88] sm:$0xff] %vm483_vm3, %v468_v51 }
  0xaa   : > { %509 = vst.msk [vmem:[%s802_s30 + $0xc8] sm:$0xff] %vm483_vm3, %v476_v52 }
  0xab   : > { %486 = vst.msk [vmem:[%s802_s30 + $0x10] sm:$0xff] %vm483_vm3, %v453_v53 }
  0xac   : > { %494 = vst.msk [vmem:[%s802_s30 + $0x50] sm:$0xff] %vm483_vm3, %v461_v54  ;;  %v416_v55 = vpop.f32.mrf.mxu2  ;;  %v436_v56 = vpop.f32.mrf.mxu3 }
  0xad   : > { %v417_v57 = vadd.f32 %v794_v24, %v416_v55  ;;  %v437_v58 = vadd.f32 %v794_v24, %v436_v56  ;;  %v378_v59 = vpop.f32.mrf.mxu0  ;;  %v398_v60 = vpop.f32.mrf.mxu1 }
  0xae   : > { %v379_v61 = vadd.f32 %v794_v24, %v378_v59  ;;  %v399_v62 = vadd.f32 %v794_v24, %v398_v60 }
  0xaf   : > { %v469_v63 = vmax.f32 %v417_v57, 0.0  ;;  %v477_v0 = vmax.f32 %v437_v58, 0.0 }
  0xb0   : > { %v454_v1 = vmax.f32 %v379_v61, 0.0  ;;  %v462_v2 = vmax.f32 %v399_v62, 0.0 }
  0xb1   : > { %502 = vst.msk [vmem:[%s802_s30 + $0x90] sm:$0xff] %vm483_vm3, %v469_v63 }
  0xb2   : > { %510 = vst.msk [vmem:[%s802_s30 + $0xd0] sm:$0xff] %vm483_vm3, %v477_v0 }
  0xb3   : > { %487 = vst.msk [vmem:[%s802_s30 + $0x18] sm:$0xff] %vm483_vm3, %v454_v1 }
  0xb4   : > { %495 = vst.msk [vmem:[%s802_s30 + $0x58] sm:$0xff] %vm483_vm3, %v462_v2  ;;  %v418_v3 = vpop.f32.mrf.mxu2  ;;  %v438_v4 = vpop.f32.mrf.mxu3 }
  0xb5   : > { %v419_v5 = vadd.f32 %v794_v24, %v418_v3  ;;  %v439_v6 = vadd.f32 %v794_v24, %v438_v4  ;;  %v381_v7 = vpop.f32.mrf.mxu0  ;;  %v401_v8 = vpop.f32.mrf.mxu1 }
  0xb6   : > { %v382_v9 = vadd.f32 %v794_v24, %v381_v7  ;;  %v402_v10 = vadd.f32 %v794_v24, %v401_v8 }
  0xb7   : > { %v470_v11 = vmax.f32 %v419_v5, 0.0  ;;  %v478_v12 = vmax.f32 %v439_v6, 0.0 }
  0xb8   : > { %v455_v13 = vmax.f32 %v382_v9, 0.0  ;;  %v463_v14 = vmax.f32 %v402_v10, 0.0 }
  0xb9   : > { %503 = vst.msk [vmem:[%s802_s30 + $0x98] sm:$0xff] %vm483_vm3, %v470_v11 }
  0xba   : > { %511 = vst.msk [vmem:[%s802_s30 + $0xd8] sm:$0xff] %vm483_vm3, %v478_v12 }
  0xbb   : > { %488 = vst.msk [vmem:[%s802_s30 + $0x20] sm:$0xff] %vm483_vm3, %v455_v13 }
  0xbc   : > { %496 = vst.msk [vmem:[%s802_s30 + $0x60] sm:$0xff] %vm483_vm3, %v463_v14  ;;  %v421_v15 = vpop.f32.mrf.mxu2  ;;  %v441_v16 = vpop.f32.mrf.mxu3 }
  0xbd   : > { %v422_v17 = vadd.f32 %v794_v24, %v421_v15  ;;  %v442_v18 = vadd.f32 %v794_v24, %v441_v16  ;;  %v383_v19 = vpop.f32.mrf.mxu0  ;;  %v403_v20 = vpop.f32.mrf.mxu1 }
  0xbe   : > { %v384_v21 = vadd.f32 %v794_v24, %v383_v19  ;;  %v404_v22 = vadd.f32 %v794_v24, %v403_v20 }
  0xbf   : > { %v471_v23 = vmax.f32 %v422_v17, 0.0  ;;  %v479_v25 = vmax.f32 %v442_v18, 0.0 }
  0xc0   : > { %v456_v26 = vmax.f32 %v384_v21, 0.0  ;;  %v464_v27 = vmax.f32 %v404_v22, 0.0 }
  0xc1   : > { %504 = vst.msk [vmem:[%s802_s30 + $0xa0] sm:$0xff] %vm483_vm3, %v471_v23 }
  0xc2   : > { %512 = vst.msk [vmem:[%s802_s30 + $0xe0] sm:$0xff] %vm483_vm3, %v479_v25 }
  0xc3   : > { %489 = vst.msk [vmem:[%s802_s30 + $0x28] sm:$0xff] %vm483_vm3, %v456_v26 }
  0xc4   : > { %497 = vst.msk [vmem:[%s802_s30 + $0x68] sm:$0xff] %vm483_vm3, %v464_v27  ;;  %v423_v28 = vpop.f32.mrf.mxu2  ;;  %v443_v29 = vpop.f32.mrf.mxu3 }
  0xc5   : > { %v424_v30 = vadd.f32 %v794_v24, %v423_v28  ;;  %v444_v31 = vadd.f32 %v794_v24, %v443_v29  ;;  %v386_v32 = vpop.f32.mrf.mxu0  ;;  %v406_v33 = vpop.f32.mrf.mxu1 }
  0xc6   : > { %v387_v34 = vadd.f32 %v794_v24, %v386_v32  ;;  %v407_v35 = vadd.f32 %v794_v24, %v406_v33 }
  0xc7   : > { %v472_v36 = vmax.f32 %v424_v30, 0.0  ;;  %v480_v37 = vmax.f32 %v444_v31, 0.0 }
  0xc8   : > { %v457_v38 = vmax.f32 %v387_v34, 0.0  ;;  %v465_v39 = vmax.f32 %v407_v35, 0.0 }
  0xc9   : > { %505 = vst.msk [vmem:[%s802_s30 + $0xa8] sm:$0xff] %vm483_vm3, %v472_v36 }
  0xca   : > { %513 = vst.msk [vmem:[%s802_s30 + $0xe8] sm:$0xff] %vm483_vm3, %v480_v37 }
  0xcb   : > { %490 = vst.msk [vmem:[%s802_s30 + $0x30] sm:$0xff] %vm483_vm3, %v457_v38 }
  0xcc   : > { %498 = vst.msk [vmem:[%s802_s30 + $0x70] sm:$0xff] %vm483_vm3, %v465_v39  ;;  %v426_v40 = vpop.f32.mrf.mxu2  ;;  %v446_v41 = vpop.f32.mrf.mxu3 }
  0xcd   : > { %v427_v42 = vadd.f32 %v794_v24, %v426_v40  ;;  %v447_v43 = vadd.f32 %v794_v24, %v446_v41  ;;  %v388_v44 = vpop.f32.mrf.mxu0  ;;  %v408_v45 = vpop.f32.mrf.mxu1 }
  0xce   : > { %v389_v46 = vadd.f32 %v794_v24, %v388_v44  ;;  %v409_v47 = vadd.f32 %v794_v24, %v408_v45 }
  0xcf   : > { %v473_v48 = vmax.f32 %v427_v42, 0.0  ;;  %v481_v49 = vmax.f32 %v447_v43, 0.0 }
  0xd0   : > { %v458_v50 = vmax.f32 %v389_v46, 0.0  ;;  %v466_v51 = vmax.f32 %v409_v47, 0.0 }
  0xd1   : > { %506 = vst.msk [vmem:[%s802_s30 + $0xb0] sm:$0xff] %vm483_vm3, %v473_v48 }
  0xd2   : > { %514 = vst.msk [vmem:[%s802_s30 + $0xf0] sm:$0xff] %vm483_vm3, %v481_v49 }
  0xd3   : > { %491 = vst.msk [vmem:[%s802_s30 + $0x38] sm:$0xff] %vm483_vm3, %v458_v50 }
  0xd4   : > { %499 = vst.msk [vmem:[%s802_s30 + $0x78] sm:$0xff] %vm483_vm3, %v466_v51  ;;  %v428_v52 = vpop.f32.mrf.mxu2  ;;  %v448_v53 = vpop.f32.mrf.mxu3 }
  0xd5   : > { %v429_v54 = vadd.f32 %v794_v24, %v428_v52  ;;  %v449_v55 = vadd.f32 %v794_v24, %v448_v53 }
  0xd7   : > { %v474_v56 = vmax.f32 %v429_v54, 0.0  ;;  %v482_v57 = vmax.f32 %v449_v55, 0.0 }
  0xd9   : > { %507 = vst.msk [vmem:[%s802_s30 + $0xb8] sm:$0xff] %vm483_vm3, %v474_v56 }
  0xda   : > { %515 = vst.msk [vmem:[%s802_s30 + $0xf8] sm:$0xff] %vm483_vm3, %v482_v57 }
  0xdb PF: > { %s13_s12 = sadd.s32 1, %s711_s12  }
  0xdc   : > { %p10_p4 = scmp.ge.s32.totalorder %s13_s12, 4  }
  0xde   :  { %12 = sbr.rel (!%p10_p4) target bundleno = 1 (0x1), region = 62 }

// kernel: resneta_forward.20
= control target key start
LH: loop header
LB: loop body
LE: loop exit
PB: predicated region body
PF: predicated region fallthrough
CT: control target
= control target key end

     0   :  { %s769_s12 = smov 0   ;;  %s942_s0 = inlined_call_operand.vmem [shape: bf16[512,72], index: 0, kind: input, shape index: {}]   ;;  %s943_s1 = inlined_call_operand.vmem [shape: bf16[72,16], index: 1, kind: input, shape index: {}]   ;;  %s944_s2 = inlined_call_operand.vmem [shape: f32[1,16], index: 2, kind: input, shape index: {}]   ;;  %s945_s3 = inlined_call_operand.vmem [shape: f32[512,16], index: 3, kind: output, shape index: {}]  }
   0x1 LB: > { %s590_s13 = sadd.s32 4294967295, %s747_s12   ;;  %p594_p0 = scmp.ge.s32.totalorder %s747_s12, 1  ;;  %s747_s12 = sphi %s769_s12, %s13_s12  }
   0x2   : > { %p138_p1 = scmp.lt.s32.totalorder %s747_s12, 3 }
   0x4   : > { %p139_p2 = pnand %p594_p0, %p138_p1 }
   0x5   : > { %s595_s16 = sshll.u32 (!%p139_p2), %s590_s13, 5 }
   0x6   : > { %142 = sbr.rel (%p139_p2) target bundleno = 231 (0xe7), region = 32  ;;  %p163_p3 = scmp.lt.s32.totalorder (!%p139_p2), %s595_s16, 63 }
   0xb   : > { %v215_v0 = vld [vmem:[%s943_s1 + $0x20] sm:$0xf]  ;;  %vm376_vm0 = vcmask 1043456   ;;  %v716_v4 = vld [vmem:[%s943_s1 + $0x18] sm:$0xff]  ;;  %v715_v5 = vld [vmem:[%s943_s1 + $0x10] sm:$0xff]  ;;  %s947_s16 = smov (!%p163_p3, %s595_s16), 63 }
   0xc   : > { %v317_v1 = vunpack.c.l.b16 %v215_v0  ;;  %v714_v6 = vld [vmem:[%s943_s1 + $0x8] sm:$0xff]  ;;  %s596_s23 = sshll.u32 %s947_s16, 2  ;;  %v713_v7 = vld [vmem:[%s943_s1] sm:$0xff]  ;;  %vm327_vm1 = vcmask 588800   ;;  %s598_s4 = sshll.u32 %s947_s16, 3  ;;  %vm501_vm2 = vcmask 130048  }
   0xd   : > { %s798_s28 = scalar_lea.vmem %s942_s0, %s596_s23  ;;  %v835_v24 = vld [vmem:[%s944_s2] ss:$0 sm:$0xff]  ;;  %s843_s7 = scalar_lea.vmem %s945_s3, %s598_s4 }
   0xe   : > { %v322_v2 = vpack.c.b16 %v317_v1, %v317_v1  ;;  %v697_v8 = vld [vmem:[%s798_s28] sm:$0xff]  ;;  %v698_v12 = vld [vmem:[%s798_s28 + $0x8] sm:$0xff]  ;;  %v699_v16 = vld [vmem:[%s798_s28 + $0x10] sm:$0xff] }
   0xf   : > { %v701_v9 = vld [vmem:[%s798_s28 + $0x20] sm:$0xff]  ;;  %v702_v13 = vld [vmem:[%s798_s28 + $0x28] sm:$0xff]  ;;  %v703_v17 = vld [vmem:[%s798_s28 + $0x30] sm:$0xff] }
  0x10   : > { %v378_v3 = vsel %vm376_vm0, %v322_v2, 0  ;;  %v705_v10 = vld [vmem:[%s798_s28 + $0x40] sm:$0xff]  ;;  %v706_v14 = vld [vmem:[%s798_s28 + $0x48] sm:$0xff]  ;;  %v707_v18 = vld [vmem:[%s798_s28 + $0x50] sm:$0xff] }
  0x11   : > { %383 = vmatpush.bf16.msra.mxu0 %v378_v3  ;;  %717 = vmatpush.bf16.msra.mxu1 %v378_v3  ;;  %v709_v11 = vld [vmem:[%s798_s28 + $0x60] sm:$0xff]  ;;  %v710_v15 = vld [vmem:[%s798_s28 + $0x68] sm:$0xff]  ;;  %v711_v19 = vld [vmem:[%s798_s28 + $0x70] sm:$0xff] }
  0x12   : > { %718 = vmatpush.bf16.msra.mxu2 %v378_v3  ;;  %719 = vmatpush.bf16.msra.mxu3 %v378_v3  ;;  %v700_v20 = vld [vmem:[%s798_s28 + $0x18] sm:$0xff] }
  0x13   : > { %v704_v21 = vld [vmem:[%s798_s28 + $0x38] sm:$0xff] }
  0x14   : > { %v708_v22 = vld [vmem:[%s798_s28 + $0x58] sm:$0xff] }
  0x15   : > { %384 = vmatpush.bf16.msra.mxu0 %v716_v4  ;;  %720 = vmatpush.bf16.msra.mxu1 %v716_v4  ;;  %v712_v23 = vld [vmem:[%s798_s28 + $0x78] sm:$0xff] }
  0x16   : > { %721 = vmatpush.bf16.msra.mxu2 %v716_v4  ;;  %722 = vmatpush.bf16.msra.mxu3 %v716_v4 }
  0x19   : > { %385 = vmatpush.bf16.msra.mxu0 %v715_v5  ;;  %723 = vmatpush.bf16.msra.mxu1 %v715_v5 }
  0x1a   : > { %724 = vmatpush.bf16.msra.mxu2 %v715_v5  ;;  %725 = vmatpush.bf16.msra.mxu3 %v715_v5 }
  0x1d   : > { %386 = vmatpush.bf16.msra.mxu0 %v714_v6  ;;  %726 = vmatpush.bf16.msra.mxu1 %v714_v6 }
  0x1e   : > { %727 = vmatpush.bf16.msra.mxu2 %v714_v6  ;;  %728 = vmatpush.bf16.msra.mxu3 %v714_v6 }
  0x21   : > { %387 = vmatpush.bf16.msra.mxu0 %v713_v7  ;;  %729 = vmatpush.bf16.msra.mxu1 %v713_v7 }
  0x22   : > { %730 = vmatpush.bf16.msra.mxu2 %v713_v7  ;;  %731 = vmatpush.bf16.msra.mxu3 %v713_v7 }
  0x24   : > { %679 = vmatmul.msk.bf16.vlgmr.msra.gmra.mxu0 %vm327_vm1, %v697_v8  ;;  %683 = vmatmul.msk.bf16.vlgmr.msra.gmra.mxu1 %vm327_vm1, %v701_v9 }
  0x25   : > { %687 = vmatmul.msk.bf16.vlgmr.msra.gmra.mxu2 %vm327_vm1, %v705_v10  ;;  %691 = vmatmul.msk.bf16.vlgmr.msra.gmra.mxu3 %vm327_vm1, %v709_v11 }
  0x34   : > { %680 = vmatmul.msk.bf16.gmra.mxu0 %vm327_vm1, %v698_v12  ;;  %684 = vmatmul.msk.bf16.gmra.mxu1 %vm327_vm1, %v702_v13 }
  0x35   : > { %688 = vmatmul.msk.bf16.gmra.mxu2 %vm327_vm1, %v706_v14  ;;  %692 = vmatmul.msk.bf16.gmra.mxu3 %vm327_vm1, %v710_v15 }
  0x44   : > { %681 = vmatmul.msk.bf16.gmra.mxu0 %vm327_vm1, %v699_v16  ;;  %685 = vmatmul.msk.bf16.gmra.mxu1 %vm327_vm1, %v703_v17 }
  0x45   : > { %689 = vmatmul.msk.bf16.gmra.mxu2 %vm327_vm1, %v707_v18  ;;  %693 = vmatmul.msk.bf16.gmra.mxu3 %vm327_vm1, %v711_v19 }
  0x54   : > { %682 = vmatmul.msk.bf16.gmra.mxu0 %vm327_vm1, %v700_v20  ;;  %686 = vmatmul.msk.bf16.gmra.mxu1 %vm327_vm1, %v704_v21 }
  0x55   : > { %690 = vmatmul.msk.bf16.gmra.mxu2 %vm327_vm1, %v708_v22  ;;  %694 = vmatmul.msk.bf16.gmra.mxu3 %vm327_vm1, %v712_v23 }
  0xa1   : > { %v389_v25 = vpop.f32.mrf.mxu0  ;;  %v409_v26 = vpop.f32.mrf.mxu1 }
  0xa2   : > { %v390_v27 = vadd.f32 %v835_v24, %v389_v25  ;;  %v410_v28 = vadd.f32 %v835_v24, %v409_v26 }
  0xa4   : > { %v469_v29 = vmax.f32 %v390_v27, 0.0  ;;  %v477_v30 = vmax.f32 %v410_v28, 0.0 }
  0xa6   : > { %502 = vst.msk [vmem:[%s843_s7] sm:$0xff] %vm501_vm2, %v469_v29 }
  0xa7   : > { %510 = vst.msk [vmem:[%s843_s7 + $0x40] sm:$0xff] %vm501_vm2, %v477_v30 }
  0xa8   : > { %v429_v31 = vpop.f32.mrf.mxu2  ;;  %v449_v32 = vpop.f32.mrf.mxu3 }
  0xa9   : > { %v430_v33 = vadd.f32 %v835_v24, %v429_v31  ;;  %v450_v34 = vadd.f32 %v835_v24, %v449_v32  ;;  %v391_v35 = vpop.f32.mrf.mxu0  ;;  %v411_v36 = vpop.f32.mrf.mxu1 }
  0xaa   : > { %v392_v37 = vadd.f32 %v835_v24, %v391_v35  ;;  %v412_v38 = vadd.f32 %v835_v24, %v411_v36 }
  0xab   : > { %v485_v39 = vmax.f32 %v430_v33, 0.0  ;;  %v493_v40 = vmax.f32 %v450_v34, 0.0 }
  0xac   : > { %v470_v41 = vmax.f32 %v392_v37, 0.0  ;;  %v478_v42 = vmax.f32 %v412_v38, 0.0 }
  0xad   : > { %518 = vst.msk [vmem:[%s843_s7 + $0x80] sm:$0xff] %vm501_vm2, %v485_v39 }
  0xae   : > { %526 = vst.msk [vmem:[%s843_s7 + $0xc0] sm:$0xff] %vm501_vm2, %v493_v40 }
  0xaf   : > { %503 = vst.msk [vmem:[%s843_s7 + $0x8] sm:$0xff] %vm501_vm2, %v470_v41 }
  0xb0   : > { %511 = vst.msk [vmem:[%s843_s7 + $0x48] sm:$0xff] %vm501_vm2, %v478_v42  ;;  %v431_v43 = vpop.f32.mrf.mxu2  ;;  %v451_v44 = vpop.f32.mrf.mxu3 }
  0xb1   : > { %v432_v45 = vadd.f32 %v835_v24, %v431_v43  ;;  %v452_v46 = vadd.f32 %v835_v24, %v451_v44  ;;  %v394_v47 = vpop.f32.mrf.mxu0  ;;  %v414_v48 = vpop.f32.mrf.mxu1 }
  0xb2   : > { %v395_v49 = vadd.f32 %v835_v24, %v394_v47  ;;  %v415_v50 = vadd.f32 %v835_v24, %v414_v48 }
  0xb3   : > { %v486_v51 = vmax.f32 %v432_v45, 0.0  ;;  %v494_v52 = vmax.f32 %v452_v46, 0.0 }
  0xb4   : > { %v471_v53 = vmax.f32 %v395_v49, 0.0  ;;  %v479_v54 = vmax.f32 %v415_v50, 0.0 }
  0xb5   : > { %519 = vst.msk [vmem:[%s843_s7 + $0x88] sm:$0xff] %vm501_vm2, %v486_v51 }
  0xb6   : > { %527 = vst.msk [vmem:[%s843_s7 + $0xc8] sm:$0xff] %vm501_vm2, %v494_v52 }
  0xb7   : > { %504 = vst.msk [vmem:[%s843_s7 + $0x10] sm:$0xff] %vm501_vm2, %v471_v53 }
  0xb8   : > { %512 = vst.msk [vmem:[%s843_s7 + $0x50] sm:$0xff] %vm501_vm2, %v479_v54  ;;  %v434_v55 = vpop.f32.mrf.mxu2  ;;  %v454_v56 = vpop.f32.mrf.mxu3 }
  0xb9   : > { %v435_v57 = vadd.f32 %v835_v24, %v434_v55  ;;  %v455_v58 = vadd.f32 %v835_v24, %v454_v56  ;;  %v396_v59 = vpop.f32.mrf.mxu0  ;;  %v416_v60 = vpop.f32.mrf.mxu1 }
  0xba   : > { %v397_v61 = vadd.f32 %v835_v24, %v396_v59  ;;  %v417_v62 = vadd.f32 %v835_v24, %v416_v60 }
  0xbb   : > { %v487_v63 = vmax.f32 %v435_v57, 0.0  ;;  %v495_v0 = vmax.f32 %v455_v58, 0.0 }
  0xbc   : > { %v472_v1 = vmax.f32 %v397_v61, 0.0  ;;  %v480_v2 = vmax.f32 %v417_v62, 0.0 }
  0xbd   : > { %520 = vst.msk [vmem:[%s843_s7 + $0x90] sm:$0xff] %vm501_vm2, %v487_v63 }
  0xbe   : > { %528 = vst.msk [vmem:[%s843_s7 + $0xd0] sm:$0xff] %vm501_vm2, %v495_v0 }
  0xbf   : > { %505 = vst.msk [vmem:[%s843_s7 + $0x18] sm:$0xff] %vm501_vm2, %v472_v1 }
  0xc0   : > { %513 = vst.msk [vmem:[%s843_s7 + $0x58] sm:$0xff] %vm501_vm2, %v480_v2  ;;  %v436_v3 = vpop.f32.mrf.mxu2  ;;  %v456_v4 = vpop.f32.mrf.mxu3 }
  0xc1   : > { %v437_v5 = vadd.f32 %v835_v24, %v436_v3  ;;  %v457_v6 = vadd.f32 %v835_v24, %v456_v4  ;;  %v399_v7 = vpop.f32.mrf.mxu0  ;;  %v419_v8 = vpop.f32.mrf.mxu1 }
  0xc2   : > { %v400_v9 = vadd.f32 %v835_v24, %v399_v7  ;;  %v420_v10 = vadd.f32 %v835_v24, %v419_v8 }
  0xc3   : > { %v488_v11 = vmax.f32 %v437_v5, 0.0  ;;  %v496_v12 = vmax.f32 %v457_v6, 0.0 }
  0xc4   : > { %v473_v13 = vmax.f32 %v400_v9, 0.0  ;;  %v481_v14 = vmax.f32 %v420_v10, 0.0 }
  0xc5   : > { %521 = vst.msk [vmem:[%s843_s7 + $0x98] sm:$0xff] %vm501_vm2, %v488_v11 }
  0xc6   : > { %529 = vst.msk [vmem:[%s843_s7 + $0xd8] sm:$0xff] %vm501_vm2, %v496_v12 }
  0xc7   : > { %506 = vst.msk [vmem:[%s843_s7 + $0x20] sm:$0xff] %vm501_vm2, %v473_v13 }
  0xc8   : > { %514 = vst.msk [vmem:[%s843_s7 + $0x60] sm:$0xff] %vm501_vm2, %v481_v14  ;;  %v439_v15 = vpop.f32.mrf.mxu2  ;;  %v459_v16 = vpop.f32.mrf.mxu3 }
  0xc9   : > { %v440_v17 = vadd.f32 %v835_v24, %v439_v15  ;;  %v460_v18 = vadd.f32 %v835_v24, %v459_v16  ;;  %v401_v19 = vpop.f32.mrf.mxu0  ;;  %v421_v20 = vpop.f32.mrf.mxu1 }
  0xca   : > { %v402_v21 = vadd.f32 %v835_v24, %v401_v19  ;;  %v422_v22 = vadd.f32 %v835_v24, %v421_v20 }
  0xcb   : > { %v489_v23 = vmax.f32 %v440_v17, 0.0  ;;  %v497_v25 = vmax.f32 %v460_v18, 0.0 }
  0xcc   : > { %v474_v26 = vmax.f32 %v402_v21, 0.0  ;;  %v482_v27 = vmax.f32 %v422_v22, 0.0 }
  0xcd   : > { %522 = vst.msk [vmem:[%s843_s7 + $0xa0] sm:$0xff] %vm501_vm2, %v489_v23 }
  0xce   : > { %530 = vst.msk [vmem:[%s843_s7 + $0xe0] sm:$0xff] %vm501_vm2, %v497_v25 }
  0xcf   : > { %507 = vst.msk [vmem:[%s843_s7 + $0x28] sm:$0xff] %vm501_vm2, %v474_v26 }
  0xd0   : > { %515 = vst.msk [vmem:[%s843_s7 + $0x68] sm:$0xff] %vm501_vm2, %v482_v27  ;;  %v441_v28 = vpop.f32.mrf.mxu2  ;;  %v461_v29 = vpop.f32.mrf.mxu3 }
  0xd1   : > { %v442_v30 = vadd.f32 %v835_v24, %v441_v28  ;;  %v462_v31 = vadd.f32 %v835_v24, %v461_v29  ;;  %v404_v32 = vpop.f32.mrf.mxu0  ;;  %v424_v33 = vpop.f32.mrf.mxu1 }
  0xd2   : > { %v405_v34 = vadd.f32 %v835_v24, %v404_v32  ;;  %v425_v35 = vadd.f32 %v835_v24, %v424_v33 }
  0xd3   : > { %v490_v36 = vmax.f32 %v442_v30, 0.0  ;;  %v498_v37 = vmax.f32 %v462_v31, 0.0 }
  0xd4   : > { %v475_v38 = vmax.f32 %v405_v34, 0.0  ;;  %v483_v39 = vmax.f32 %v425_v35, 0.0 }
  0xd5   : > { %523 = vst.msk [vmem:[%s843_s7 + $0xa8] sm:$0xff] %vm501_vm2, %v490_v36 }
  0xd6   : > { %531 = vst.msk [vmem:[%s843_s7 + $0xe8] sm:$0xff] %vm501_vm2, %v498_v37 }
  0xd7   : > { %508 = vst.msk [vmem:[%s843_s7 + $0x30] sm:$0xff] %vm501_vm2, %v475_v38 }
  0xd8   : > { %516 = vst.msk [vmem:[%s843_s7 + $0x70] sm:$0xff] %vm501_vm2, %v483_v39  ;;  %v444_v40 = vpop.f32.mrf.mxu2  ;;  %v464_v41 = vpop.f32.mrf.mxu3 }
  0xd9   : > { %v445_v42 = vadd.f32 %v835_v24, %v444_v40  ;;  %v465_v43 = vadd.f32 %v835_v24, %v464_v41  ;;  %v406_v44 = vpop.f32.mrf.mxu0  ;;  %v426_v45 = vpop.f32.mrf.mxu1 }
  0xda   : > { %v407_v46 = vadd.f32 %v835_v24, %v406_v44  ;;  %v427_v47 = vadd.f32 %v835_v24, %v426_v45 }
  0xdb   : > { %v491_v48 = vmax.f32 %v445_v42, 0.0  ;;  %v499_v49 = vmax.f32 %v465_v43, 0.0 }
  0xdc   : > { %v476_v50 = vmax.f32 %v407_v46, 0.0  ;;  %v484_v51 = vmax.f32 %v427_v47, 0.0 }
  0xdd   : > { %524 = vst.msk [vmem:[%s843_s7 + $0xb0] sm:$0xff] %vm501_vm2, %v491_v48 }
  0xde   : > { %532 = vst.msk [vmem:[%s843_s7 + $0xf0] sm:$0xff] %vm501_vm2, %v499_v49 }
  0xdf   : > { %509 = vst.msk [vmem:[%s843_s7 + $0x38] sm:$0xff] %vm501_vm2, %v476_v50 }
  0xe0   : > { %517 = vst.msk [vmem:[%s843_s7 + $0x78] sm:$0xff] %vm501_vm2, %v484_v51  ;;  %v446_v52 = vpop.f32.mrf.mxu2  ;;  %v466_v53 = vpop.f32.mrf.mxu3 }
  0xe1   : > { %v447_v54 = vadd.f32 %v835_v24, %v446_v52  ;;  %v467_v55 = vadd.f32 %v835_v24, %v466_v53 }
  0xe3   : > { %v492_v56 = vmax.f32 %v447_v54, 0.0  ;;  %v500_v57 = vmax.f32 %v467_v55, 0.0 }
  0xe5   : > { %525 = vst.msk [vmem:[%s843_s7 + $0xb8] sm:$0xff] %vm501_vm2, %v492_v56 }
  0xe6   : > { %533 = vst.msk [vmem:[%s843_s7 + $0xf8] sm:$0xff] %vm501_vm2, %v500_v57 }
  0xe7 PF: > { %s13_s12 = sadd.s32 1, %s747_s12  }
  0xe8   : > { %p10_p4 = scmp.ge.s32.totalorder %s13_s12, 4  }
  0xea   :  { %12 = sbr.rel (!%p10_p4) target bundleno = 1 (0x1), region = 62 }

// kernel: resneta_forward.19
= control target key start
LH: loop header
LB: loop body
LE: loop exit
PB: predicated region body
PF: predicated region fallthrough
CT: control target
= control target key end

     0   :  { %s769_s12 = smov 0   ;;  %s942_s0 = inlined_call_operand.vmem [shape: bf16[512,72], index: 0, kind: input, shape index: {}]   ;;  %s943_s1 = inlined_call_operand.vmem [shape: bf16[72,8], index: 1, kind: input, shape index: {}]   ;;  %s944_s2 = inlined_call_operand.vmem [shape: f32[1,8], index: 2, kind: input, shape index: {}]   ;;  %s945_s3 = inlined_call_operand.vmem [shape: f32[512,8], index: 3, kind: output, shape index: {}]  }
   0x1 LB: > { %s590_s13 = sadd.s32 4294967295, %s747_s12   ;;  %p594_p0 = scmp.ge.s32.totalorder %s747_s12, 1  ;;  %s747_s12 = sphi %s769_s12, %s13_s12  }
   0x2   : > { %p138_p1 = scmp.lt.s32.totalorder %s747_s12, 3 }
   0x4   : > { %p139_p2 = pnand %p594_p0, %p138_p1 }
   0x5   : > { %s595_s16 = sshll.u32 (!%p139_p2), %s590_s13, 5 }
   0x6   : > { %142 = sbr.rel (%p139_p2) target bundleno = 231 (0xe7), region = 32  ;;  %p163_p3 = scmp.lt.s32.totalorder (!%p139_p2), %s595_s16, 63 }
   0xb   : > { %v215_v0 = vld [vmem:[%s943_s1 + $0x20] sm:$0xf]  ;;  %vm376_vm0 = vcmask 1043456   ;;  %v716_v4 = vld [vmem:[%s943_s1 + $0x18] sm:$0xff]  ;;  %v715_v5 = vld [vmem:[%s943_s1 + $0x10] sm:$0xff]  ;;  %s947_s16 = smov (!%p163_p3, %s595_s16), 63 }
   0xc   : > { %v317_v1 = vunpack.c.l.b16 %v215_v0  ;;  %v714_v6 = vld [vmem:[%s943_s1 + $0x8] sm:$0xff]  ;;  %s596_s23 = sshll.u32 %s947_s16, 2  ;;  %v713_v7 = vld [vmem:[%s943_s1] sm:$0xff]  ;;  %vm327_vm1 = vcmask 588800   ;;  %s598_s4 = sshll.u32 %s947_s16, 3  ;;  %vm501_vm2 = vcmask 64512  }
   0xd   : > { %s798_s28 = scalar_lea.vmem %s942_s0, %s596_s23  ;;  %v835_v24 = vld [vmem:[%s944_s2] ss:$0 sm:$0xff]  ;;  %s843_s7 = scalar_lea.vmem %s945_s3, %s598_s4 }
   0xe   : > { %v322_v2 = vpack.c.b16 %v317_v1, %v317_v1  ;;  %v697_v8 = vld [vmem:[%s798_s28] sm:$0xff]  ;;  %v698_v12 = vld [vmem:[%s798_s28 + $0x8] sm:$0xff]  ;;  %v699_v16 = vld [vmem:[%s798_s28 + $0x10] sm:$0xff] }
   0xf   : > { %v701_v9 = vld [vmem:[%s798_s28 + $0x20] sm:$0xff]  ;;  %v702_v13 = vld [vmem:[%s798_s28 + $0x28] sm:$0xff]  ;;  %v703_v17 = vld [vmem:[%s798_s28 + $0x30] sm:$0xff] }
  0x10   : > { %v378_v3 = vsel %vm376_vm0, %v322_v2, 0  ;;  %v705_v10 = vld [vmem:[%s798_s28 + $0x40] sm:$0xff]  ;;  %v706_v14 = vld [vmem:[%s798_s28 + $0x48] sm:$0xff]  ;;  %v707_v18 = vld [vmem:[%s798_s28 + $0x50] sm:$0xff] }
  0x11   : > { %383 = vmatpush.bf16.msra.mxu0 %v378_v3  ;;  %717 = vmatpush.bf16.msra.mxu1 %v378_v3  ;;  %v709_v11 = vld [vmem:[%s798_s28 + $0x60] sm:$0xff]  ;;  %v710_v15 = vld [vmem:[%s798_s28 + $0x68] sm:$0xff]  ;;  %v711_v19 = vld [vmem:[%s798_s28 + $0x70] sm:$0xff] }
  0x12   : > { %718 = vmatpush.bf16.msra.mxu2 %v378_v3  ;;  %719 = vmatpush.bf16.msra.mxu3 %v378_v3  ;;  %v700_v20 = vld [vmem:[%s798_s28 + $0x18] sm:$0xff] }
  0x13   : > { %v704_v21 = vld [vmem:[%s798_s28 + $0x38] sm:$0xff] }
  0x14   : > { %v708_v22 = vld [vmem:[%s798_s28 + $0x58] sm:$0xff] }
  0x15   : > { %384 = vmatpush.bf16.msra.mxu0 %v716_v4  ;;  %720 = vmatpush.bf16.msra.mxu1 %v716_v4  ;;  %v712_v23 = vld [vmem:[%s798_s28 + $0x78] sm:$0xff] }
  0x16   : > { %721 = vmatpush.bf16.msra.mxu2 %v716_v4  ;;  %722 = vmatpush.bf16.msra.mxu3 %v716_v4 }
  0x19   : > { %385 = vmatpush.bf16.msra.mxu0 %v715_v5  ;;  %723 = vmatpush.bf16.msra.mxu1 %v715_v5 }
  0x1a   : > { %724 = vmatpush.bf16.msra.mxu2 %v715_v5  ;;  %725 = vmatpush.bf16.msra.mxu3 %v715_v5 }
  0x1d   : > { %386 = vmatpush.bf16.msra.mxu0 %v714_v6  ;;  %726 = vmatpush.bf16.msra.mxu1 %v714_v6 }
  0x1e   : > { %727 = vmatpush.bf16.msra.mxu2 %v714_v6  ;;  %728 = vmatpush.bf16.msra.mxu3 %v714_v6 }
  0x21   : > { %387 = vmatpush.bf16.msra.mxu0 %v713_v7  ;;  %729 = vmatpush.bf16.msra.mxu1 %v713_v7 }
  0x22   : > { %730 = vmatpush.bf16.msra.mxu2 %v713_v7  ;;  %731 = vmatpush.bf16.msra.mxu3 %v713_v7 }
  0x24   : > { %679 = vmatmul.msk.bf16.vlgmr.msra.gmra.mxu0 %vm327_vm1, %v697_v8  ;;  %683 = vmatmul.msk.bf16.vlgmr.msra.gmra.mxu1 %vm327_vm1, %v701_v9 }
  0x25   : > { %687 = vmatmul.msk.bf16.vlgmr.msra.gmra.mxu2 %vm327_vm1, %v705_v10  ;;  %691 = vmatmul.msk.bf16.vlgmr.msra.gmra.mxu3 %vm327_vm1, %v709_v11 }
  0x34   : > { %680 = vmatmul.msk.bf16.gmra.mxu0 %vm327_vm1, %v698_v12  ;;  %684 = vmatmul.msk.bf16.gmra.mxu1 %vm327_vm1, %v702_v13 }
  0x35   : > { %688 = vmatmul.msk.bf16.gmra.mxu2 %vm327_vm1, %v706_v14  ;;  %692 = vmatmul.msk.bf16.gmra.mxu3 %vm327_vm1, %v710_v15 }
  0x44   : > { %681 = vmatmul.msk.bf16.gmra.mxu0 %vm327_vm1, %v699_v16  ;;  %685 = vmatmul.msk.bf16.gmra.mxu1 %vm327_vm1, %v703_v17 }
  0x45   : > { %689 = vmatmul.msk.bf16.gmra.mxu2 %vm327_vm1, %v707_v18  ;;  %693 = vmatmul.msk.bf16.gmra.mxu3 %vm327_vm1, %v711_v19 }
  0x54   : > { %682 = vmatmul.msk.bf16.gmra.mxu0 %vm327_vm1, %v700_v20  ;;  %686 = vmatmul.msk.bf16.gmra.mxu1 %vm327_vm1, %v704_v21 }
  0x55   : > { %690 = vmatmul.msk.bf16.gmra.mxu2 %vm327_vm1, %v708_v22  ;;  %694 = vmatmul.msk.bf16.gmra.mxu3 %vm327_vm1, %v712_v23 }
  0xa1   : > { %v389_v25 = vpop.f32.mrf.mxu0  ;;  %v409_v26 = vpop.f32.mrf.mxu1 }
  0xa2   : > { %v390_v27 = vadd.f32 %v835_v24, %v389_v25  ;;  %v410_v28 = vadd.f32 %v835_v24, %v409_v26 }
  0xa4   : > { %v469_v29 = vmax.f32 %v390_v27, 0.0  ;;  %v477_v30 = vmax.f32 %v410_v28, 0.0 }
  0xa6   : > { %502 = vst.msk [vmem:[%s843_s7] sm:$0xff] %vm501_vm2, %v469_v29 }
  0xa7   : > { %510 = vst.msk [vmem:[%s843_s7 + $0x40] sm:$0xff] %vm501_vm2, %v477_v30 }
  0xa8   : > { %v429_v31 = vpop.f32.mrf.mxu2  ;;  %v449_v32 = vpop.f32.mrf.mxu3 }
  0xa9   : > { %v430_v33 = vadd.f32 %v835_v24, %v429_v31  ;;  %v450_v34 = vadd.f32 %v835_v24, %v449_v32  ;;  %v391_v35 = vpop.f32.mrf.mxu0  ;;  %v411_v36 = vpop.f32.mrf.mxu1 }
  0xaa   : > { %v392_v37 = vadd.f32 %v835_v24, %v391_v35  ;;  %v412_v38 = vadd.f32 %v835_v24, %v411_v36 }
  0xab   : > { %v485_v39 = vmax.f32 %v430_v33, 0.0  ;;  %v493_v40 = vmax.f32 %v450_v34, 0.0 }
  0xac   : > { %v470_v41 = vmax.f32 %v392_v37, 0.0  ;;  %v478_v42 = vmax.f32 %v412_v38, 0.0 }
  0xad   : > { %518 = vst.msk [vmem:[%s843_s7 + $0x80] sm:$0xff] %vm501_vm2, %v485_v39 }
  0xae   : > { %526 = vst.msk [vmem:[%s843_s7 + $0xc0] sm:$0xff] %vm501_vm2, %v493_v40 }
  0xaf   : > { %503 = vst.msk [vmem:[%s843_s7 + $0x8] sm:$0xff] %vm501_vm2, %v470_v41 }
  0xb0   : > { %511 = vst.msk [vmem:[%s843_s7 + $0x48] sm:$0xff] %vm501_vm2, %v478_v42  ;;  %v431_v43 = vpop.f32.mrf.mxu2  ;;  %v451_v44 = vpop.f32.mrf.mxu3 }
  0xb1   : > { %v432_v45 = vadd.f32 %v835_v24, %v431_v43  ;;  %v452_v46 = vadd.f32 %v835_v24, %v451_v44  ;;  %v394_v47 = vpop.f32.mrf.mxu0  ;;  %v414_v48 = vpop.f32.mrf.mxu1 }
  0xb2   : > { %v395_v49 = vadd.f32 %v835_v24, %v394_v47  ;;  %v415_v50 = vadd.f32 %v835_v24, %v414_v48 }
  0xb3   : > { %v486_v51 = vmax.f32 %v432_v45, 0.0  ;;  %v494_v52 = vmax.f32 %v452_v46, 0.0 }
  0xb4   : > { %v471_v53 = vmax.f32 %v395_v49, 0.0  ;;  %v479_v54 = vmax.f32 %v415_v50, 0.0 }
  0xb5   : > { %519 = vst.msk [vmem:[%s843_s7 + $0x88] sm:$0xff] %vm501_vm2, %v486_v51 }
  0xb6   : > { %527 = vst.msk [vmem:[%s843_s7 + $0xc8] sm:$0xff] %vm501_vm2, %v494_v52 }
  0xb7   : > { %504 = vst.msk [vmem:[%s843_s7 + $0x10] sm:$0xff] %vm501_vm2, %v471_v53 }
  0xb8   : > { %512 = vst.msk [vmem:[%s843_s7 + $0x50] sm:$0xff] %vm501_vm2, %v479_v54  ;;  %v434_v55 = vpop.f32.mrf.mxu2  ;;  %v454_v56 = vpop.f32.mrf.mxu3 }
  0xb9   : > { %v435_v57 = vadd.f32 %v835_v24, %v434_v55  ;;  %v455_v58 = vadd.f32 %v835_v24, %v454_v56  ;;  %v396_v59 = vpop.f32.mrf.mxu0  ;;  %v416_v60 = vpop.f32.mrf.mxu1 }
  0xba   : > { %v397_v61 = vadd.f32 %v835_v24, %v396_v59  ;;  %v417_v62 = vadd.f32 %v835_v24, %v416_v60 }
  0xbb   : > { %v487_v63 = vmax.f32 %v435_v57, 0.0  ;;  %v495_v0 = vmax.f32 %v455_v58, 0.0 }
  0xbc   : > { %v472_v1 = vmax.f32 %v397_v61, 0.0  ;;  %v480_v2 = vmax.f32 %v417_v62, 0.0 }
  0xbd   : > { %520 = vst.msk [vmem:[%s843_s7 + $0x90] sm:$0xff] %vm501_vm2, %v487_v63 }
  0xbe   : > { %528 = vst.msk [vmem:[%s843_s7 + $0xd0] sm:$0xff] %vm501_vm2, %v495_v0 }
  0xbf   : > { %505 = vst.msk [vmem:[%s843_s7 + $0x18] sm:$0xff] %vm501_vm2, %v472_v1 }
  0xc0   : > { %513 = vst.msk [vmem:[%s843_s7 + $0x58] sm:$0xff] %vm501_vm2, %v480_v2  ;;  %v436_v3 = vpop.f32.mrf.mxu2  ;;  %v456_v4 = vpop.f32.mrf.mxu3 }
  0xc1   : > { %v437_v5 = vadd.f32 %v835_v24, %v436_v3  ;;  %v457_v6 = vadd.f32 %v835_v24, %v456_v4  ;;  %v399_v7 = vpop.f32.mrf.mxu0  ;;  %v419_v8 = vpop.f32.mrf.mxu1 }
  0xc2   : > { %v400_v9 = vadd.f32 %v835_v24, %v399_v7  ;;  %v420_v10 = vadd.f32 %v835_v24, %v419_v8 }
  0xc3   : > { %v488_v11 = vmax.f32 %v437_v5, 0.0  ;;  %v496_v12 = vmax.f32 %v457_v6, 0.0 }
  0xc4   : > { %v473_v13 = vmax.f32 %v400_v9, 0.0  ;;  %v481_v14 = vmax.f32 %v420_v10, 0.0 }
  0xc5   : > { %521 = vst.msk [vmem:[%s843_s7 + $0x98] sm:$0xff] %vm501_vm2, %v488_v11 }
  0xc6   : > { %529 = vst.msk [vmem:[%s843_s7 + $0xd8] sm:$0xff] %vm501_vm2, %v496_v12 }
  0xc7   : > { %506 = vst.msk [vmem:[%s843_s7 + $0x20] sm:$0xff] %vm501_vm2, %v473_v13 }
  0xc8   : > { %514 = vst.msk [vmem:[%s843_s7 + $0x60] sm:$0xff] %vm501_vm2, %v481_v14  ;;  %v439_v15 = vpop.f32.mrf.mxu2  ;;  %v459_v16 = vpop.f32.mrf.mxu3 }
  0xc9   : > { %v440_v17 = vadd.f32 %v835_v24, %v439_v15  ;;  %v460_v18 = vadd.f32 %v835_v24, %v459_v16  ;;  %v401_v19 = vpop.f32.mrf.mxu0  ;;  %v421_v20 = vpop.f32.mrf.mxu1 }
  0xca   : > { %v402_v21 = vadd.f32 %v835_v24, %v401_v19  ;;  %v422_v22 = vadd.f32 %v835_v24, %v421_v20 }
  0xcb   : > { %v489_v23 = vmax.f32 %v440_v17, 0.0  ;;  %v497_v25 = vmax.f32 %v460_v18, 0.0 }
  0xcc   : > { %v474_v26 = vmax.f32 %v402_v21, 0.0  ;;  %v482_v27 = vmax.f32 %v422_v22, 0.0 }
  0xcd   : > { %522 = vst.msk [vmem:[%s843_s7 + $0xa0] sm:$0xff] %vm501_vm2, %v489_v23 }
  0xce   : > { %530 = vst.msk [vmem:[%s843_s7 + $0xe0] sm:$0xff] %vm501_vm2, %v497_v25 }
  0xcf   : > { %507 = vst.msk [vmem:[%s843_s7 + $0x28] sm:$0xff] %vm501_vm2, %v474_v26 }
  0xd0   : > { %515 = vst.msk [vmem:[%s843_s7 + $0x68] sm:$0xff] %vm501_vm2, %v482_v27  ;;  %v441_v28 = vpop.f32.mrf.mxu2  ;;  %v461_v29 = vpop.f32.mrf.mxu3 }
  0xd1   : > { %v442_v30 = vadd.f32 %v835_v24, %v441_v28  ;;  %v462_v31 = vadd.f32 %v835_v24, %v461_v29  ;;  %v404_v32 = vpop.f32.mrf.mxu0  ;;  %v424_v33 = vpop.f32.mrf.mxu1 }
  0xd2   : > { %v405_v34 = vadd.f32 %v835_v24, %v404_v32  ;;  %v425_v35 = vadd.f32 %v835_v24, %v424_v33 }
  0xd3   : > { %v490_v36 = vmax.f32 %v442_v30, 0.0  ;;  %v498_v37 = vmax.f32 %v462_v31, 0.0 }
  0xd4   : > { %v475_v38 = vmax.f32 %v405_v34, 0.0  ;;  %v483_v39 = vmax.f32 %v425_v35, 0.0 }
  0xd5   : > { %523 = vst.msk [vmem:[%s843_s7 + $0xa8] sm:$0xff] %vm501_vm2, %v490_v36 }
  0xd6   : > { %531 = vst.msk [vmem:[%s843_s7 + $0xe8] sm:$0xff] %vm501_vm2, %v498_v37 }
  0xd7   : > { %508 = vst.msk [vmem:[%s843_s7 + $0x30] sm:$0xff] %vm501_vm2, %v475_v38 }
  0xd8   : > { %516 = vst.msk [vmem:[%s843_s7 + $0x70] sm:$0xff] %vm501_vm2, %v483_v39  ;;  %v444_v40 = vpop.f32.mrf.mxu2  ;;  %v464_v41 = vpop.f32.mrf.mxu3 }
  0xd9   : > { %v445_v42 = vadd.f32 %v835_v24, %v444_v40  ;;  %v465_v43 = vadd.f32 %v835_v24, %v464_v41  ;;  %v406_v44 = vpop.f32.mrf.mxu0  ;;  %v426_v45 = vpop.f32.mrf.mxu1 }
  0xda   : > { %v407_v46 = vadd.f32 %v835_v24, %v406_v44  ;;  %v427_v47 = vadd.f32 %v835_v24, %v426_v45 }
  0xdb   : > { %v491_v48 = vmax.f32 %v445_v42, 0.0  ;;  %v499_v49 = vmax.f32 %v465_v43, 0.0 }
  0xdc   : > { %v476_v50 = vmax.f32 %v407_v46, 0.0  ;;  %v484_v51 = vmax.f32 %v427_v47, 0.0 }
  0xdd   : > { %524 = vst.msk [vmem:[%s843_s7 + $0xb0] sm:$0xff] %vm501_vm2, %v491_v48 }
  0xde   : > { %532 = vst.msk [vmem:[%s843_s7 + $0xf0] sm:$0xff] %vm501_vm2, %v499_v49 }
  0xdf   : > { %509 = vst.msk [vmem:[%s843_s7 + $0x38] sm:$0xff] %vm501_vm2, %v476_v50 }
  0xe0   : > { %517 = vst.msk [vmem:[%s843_s7 + $0x78] sm:$0xff] %vm501_vm2, %v484_v51  ;;  %v446_v52 = vpop.f32.mrf.mxu2  ;;  %v466_v53 = vpop.f32.mrf.mxu3 }
  0xe1   : > { %v447_v54 = vadd.f32 %v835_v24, %v446_v52  ;;  %v467_v55 = vadd.f32 %v835_v24, %v466_v53 }
  0xe3   : > { %v492_v56 = vmax.f32 %v447_v54, 0.0  ;;  %v500_v57 = vmax.f32 %v467_v55, 0.0 }
  0xe5   : > { %525 = vst.msk [vmem:[%s843_s7 + $0xb8] sm:$0xff] %vm501_vm2, %v492_v56 }
  0xe6   : > { %533 = vst.msk [vmem:[%s843_s7 + $0xf8] sm:$0xff] %vm501_vm2, %v500_v57 }
  0xe7 PF: > { %s13_s12 = sadd.s32 1, %s747_s12  }
  0xe8   : > { %p10_p4 = scmp.ge.s32.totalorder %s13_s12, 4  }
  0xea   :  { %12 = sbr.rel (!%p10_p4) target bundleno = 1 (0x1), region = 62 }

// kernel: resneta_forward.21
= control target key start
LH: loop header
LB: loop body
LE: loop exit
PB: predicated region body
PF: predicated region fallthrough
CT: control target
= control target key end

     0   :  { %s118_s0 = inlined_call_operand.vmem [shape: f32[9,16,128], index: 0, kind: input, shape index: {}]   ;;  %s119_s1 = inlined_call_operand.vmem [shape: f32[16,128], index: 1, kind: output, shape index: {}]  }
   0x1   :  { %v8_v0 = vld [vmem:[%s118_s0] sm:$0xff]  ;;  %v10_v1 = vld [vmem:[%s118_s0 + $0x10] sm:$0xff]  ;;  %v9_v12 = vld [vmem:[%s118_s0 + $0x8] sm:$0xff] }
   0x2   :  { %v12_v2 = vld [vmem:[%s118_s0 + $0x20] sm:$0xff]  ;;  %v14_v3 = vld [vmem:[%s118_s0 + $0x30] sm:$0xff]  ;;  %v11_v13 = vld [vmem:[%s118_s0 + $0x18] sm:$0xff] }
   0x3   :  { %v16_v4 = vld [vmem:[%s118_s0 + $0x40] sm:$0xff]  ;;  %v18_v5 = vld [vmem:[%s118_s0 + $0x50] sm:$0xff]  ;;  %v26_v6 = vmax.f32 %v8_v0, %v12_v2  ;;  %v27_v10 = vmax.f32 %v10_v1, %v14_v3  ;;  %v13_v14 = vld [vmem:[%s118_s0 + $0x28] sm:$0xff] }
   0x4   :  { %v20_v7 = vld [vmem:[%s118_s0 + $0x60] sm:$0xff]  ;;  %v22_v8 = vld [vmem:[%s118_s0 + $0x70] sm:$0xff]  ;;  %v15_v16 = vld [vmem:[%s118_s0 + $0x38] sm:$0xff]  ;;  %v34_v19 = vmax.f32 %v9_v12, %v13_v14 }
   0x5   :  { %v24_v9 = vld [vmem:[%s118_s0 + $0x80] sm:$0xff]  ;;  %v28_v11 = vmax.f32 %v26_v6, %v16_v4  ;;  %v29_v15 = vmax.f32 %v27_v10, %v18_v5  ;;  %v17_v17 = vld [vmem:[%s118_s0 + $0x48] sm:$0xff]  ;;  %v19_v18 = vld [vmem:[%s118_s0 + $0x58] sm:$0xff]  ;;  %v35_v22 = vmax.f32 %v11_v13, %v15_v16 }
   0x6   :  { %v21_v21 = vld [vmem:[%s118_s0 + $0x68] sm:$0xff]  ;;  %v23_v24 = vld [vmem:[%s118_s0 + $0x78] sm:$0xff]  ;;  %v36_v25 = vmax.f32 %v34_v19, %v17_v17 }
   0x7   :  { %v30_v20 = vmax.f32 %v28_v11, %v20_v7  ;;  %v31_v23 = vmax.f32 %v29_v15, %v22_v8  ;;  %v25_v27 = vld [vmem:[%s118_s0 + $0x88] sm:$0xff]  ;;  %v37_v28 = vmax.f32 %v35_v22, %v19_v18 }
   0x8   :  { %v38_v29 = vmax.f32 %v36_v25, %v21_v21 }
   0x9   :  { %v32_v26 = vmax.f32 %v30_v20, %v24_v9  ;;  %v39_v31 = vmax.f32 %v37_v28, %v23_v24 }
   0xa   :  { %v40_v32 = vmax.f32 %v38_v29, %v25_v27 }
   0xb   :  { %v33_v30 = vmax.f32 %v32_v26, %v31_v23 }
   0xc   :  { %v41_v33 = vmax.f32 %v40_v32, %v39_v31 }
   0xd   :  { %42 = vst [vmem:[%s119_s1] sm:$0xff] %v33_v30 }
   0xe   :  { %43 = vst [vmem:[%s119_s1 + $0x8] sm:$0xff] %v41_v33 }

// kernel: resneta_forward.22
= control target key start
LH: loop header
LB: loop body
LE: loop exit
PB: predicated region body
PF: predicated region fallthrough
CT: control target
= control target key end

     0   :  { %vm83_vm0 = vcmask 130048   ;;  %vm173_vm1 = vcmask 31744   ;;  %s373_s1 = inlined_call_operand.vmem [shape: bf16[16,4], index: 1, kind: input, shape index: {}]   ;;  %s374_s0 = inlined_call_operand.vmem [shape: bf16[128,16], index: 0, kind: input, shape index: {}]   ;;  %s375_s2 = inlined_call_operand.vmem [shape: f32[1,4], index: 2, kind: input, shape index: {}]   ;;  %s376_s3 = inlined_call_operand.vmem [shape: f32[128,4], index: 3, kind: output, shape index: {}]  }
   0x1   :  { %v246_v0 = vld [vmem:[%s373_s1] sm:$0xff]  ;;  %v240_v2 = vld [vmem:[%s374_s0 + $0x10] sm:$0xff]  ;;  %v239_v5 = vld [vmem:[%s374_s0 + $0x8] sm:$0xff] }
   0x2   :  { %v238_v1 = vld [vmem:[%s374_s0] sm:$0xff]  ;;  %115 = vmatpush.bf16.msra.mxu0 %v246_v0  ;;  %247 = vmatpush.bf16.msra.mxu1 %v246_v0  ;;  %v244_v4 = vld [vmem:[%s374_s0 + $0x30] sm:$0xff]  ;;  %v241_v6 = vld [vmem:[%s374_s0 + $0x18] sm:$0xff] }
   0x3   :  { %v242_v3 = vld [vmem:[%s374_s0 + $0x20] sm:$0xff]  ;;  %248 = vmatpush.bf16.msra.mxu2 %v246_v0  ;;  %249 = vmatpush.bf16.msra.mxu3 %v246_v0  ;;  %v243_v7 = vld [vmem:[%s374_s0 + $0x28] sm:$0xff]  ;;  %v245_v8 = vld [vmem:[%s374_s0 + $0x38] sm:$0xff] }
   0x4   :  { %v250_v9 = vld [vmem:[%s375_s2] ss:$0 sm:$0xff] }
   0x5   :  { %230 = vmatmul.msk.bf16.vlgmr.msra.gmra.mxu0 %vm83_vm0, %v238_v1  ;;  %232 = vmatmul.msk.bf16.vlgmr.msra.gmra.mxu1 %vm83_vm0, %v240_v2 }
   0x6   :  { %234 = vmatmul.msk.bf16.vlgmr.msra.gmra.mxu2 %vm83_vm0, %v242_v3  ;;  %236 = vmatmul.msk.bf16.vlgmr.msra.gmra.mxu3 %vm83_vm0, %v244_v4 }
  0x15   :  { %231 = vmatmul.msk.bf16.gmra.mxu0 %vm83_vm0, %v239_v5  ;;  %233 = vmatmul.msk.bf16.gmra.mxu1 %vm83_vm0, %v241_v6 }
  0x16   :  { %235 = vmatmul.msk.bf16.gmra.mxu2 %vm83_vm0, %v243_v7  ;;  %237 = vmatmul.msk.bf16.gmra.mxu3 %vm83_vm0, %v245_v8 }
  0x82   :  { %v117_v10 = vpop.f32.mrf.mxu0  ;;  %v127_v11 = vpop.f32.mrf.mxu1 }
  0x83   :  { %v118_v12 = vadd.f32 %v250_v9, %v117_v10  ;;  %v128_v13 = vadd.f32 %v250_v9, %v127_v11 }
  0x85   :  { %v157_v14 = vmax.f32 %v118_v12, 0.0  ;;  %v161_v15 = vmax.f32 %v128_v13, 0.0 }
  0x87   :  { %174 = vst.msk [vmem:[%s376_s3] sm:$0xff] %vm173_vm1, %v157_v14 }
  0x88   :  { %178 = vst.msk [vmem:[%s376_s3 + $0x20] sm:$0xff] %vm173_vm1, %v161_v15 }
  0x89   :  { %v137_v16 = vpop.f32.mrf.mxu2  ;;  %v147_v17 = vpop.f32.mrf.mxu3 }
  0x8a   :  { %v138_v18 = vadd.f32 %v250_v9, %v137_v16  ;;  %v148_v19 = vadd.f32 %v250_v9, %v147_v17  ;;  %v119_v20 = vpop.f32.mrf.mxu0  ;;  %v129_v21 = vpop.f32.mrf.mxu1 }
  0x8b   :  { %v120_v22 = vadd.f32 %v250_v9, %v119_v20  ;;  %v130_v23 = vadd.f32 %v250_v9, %v129_v21 }
  0x8c   :  { %v165_v24 = vmax.f32 %v138_v18, 0.0  ;;  %v169_v25 = vmax.f32 %v148_v19, 0.0 }
  0x8d   :  { %v158_v26 = vmax.f32 %v120_v22, 0.0  ;;  %v162_v27 = vmax.f32 %v130_v23, 0.0 }
  0x8e   :  { %182 = vst.msk [vmem:[%s376_s3 + $0x40] sm:$0xff] %vm173_vm1, %v165_v24 }
  0x8f   :  { %186 = vst.msk [vmem:[%s376_s3 + $0x60] sm:$0xff] %vm173_vm1, %v169_v25 }
  0x90   :  { %175 = vst.msk [vmem:[%s376_s3 + $0x8] sm:$0xff] %vm173_vm1, %v158_v26 }
  0x91   :  { %179 = vst.msk [vmem:[%s376_s3 + $0x28] sm:$0xff] %vm173_vm1, %v162_v27  ;;  %v139_v28 = vpop.f32.mrf.mxu2  ;;  %v149_v29 = vpop.f32.mrf.mxu3 }
  0x92   :  { %v140_v30 = vadd.f32 %v250_v9, %v139_v28  ;;  %v150_v31 = vadd.f32 %v250_v9, %v149_v29  ;;  %v122_v32 = vpop.f32.mrf.mxu0  ;;  %v132_v33 = vpop.f32.mrf.mxu1 }
  0x93   :  { %v123_v34 = vadd.f32 %v250_v9, %v122_v32  ;;  %v133_v35 = vadd.f32 %v250_v9, %v132_v33 }
  0x94   :  { %v166_v36 = vmax.f32 %v140_v30, 0.0  ;;  %v170_v37 = vmax.f32 %v150_v31, 0.0 }
  0x95   :  { %v159_v38 = vmax.f32 %v123_v34, 0.0  ;;  %v163_v39 = vmax.f32 %v133_v35, 0.0 }
  0x96   :  { %183 = vst.msk [vmem:[%s376_s3 + $0x48] sm:$0xff] %vm173_vm1, %v166_v36 }
  0x97   :  { %187 = vst.msk [vmem:[%s376_s3 + $0x68] sm:$0xff] %vm173_vm1, %v170_v37 }
  0x98   :  { %176 = vst.msk [vmem:[%s376_s3 + $0x10] sm:$0xff] %vm173_vm1, %v159_v38 }
  0x99   :  { %180 = vst.msk [vmem:[%s376_s3 + $0x30] sm:$0xff] %vm173_vm1, %v163_v39  ;;  %v142_v40 = vpop.f32.mrf.mxu2  ;;  %v152_v41 = vpop.f32.mrf.mxu3 }
  0x9a   :  { %v143_v42 = vadd.f32 %v250_v9, %v142_v40  ;;  %v153_v43 = vadd.f32 %v250_v9, %v152_v41  ;;  %v124_v44 = vpop.f32.mrf.mxu0  ;;  %v134_v45 = vpop.f32.mrf.mxu1 }
  0x9b   :  { %v125_v46 = vadd.f32 %v250_v9, %v124_v44  ;;  %v135_v47 = vadd.f32 %v250_v9, %v134_v45 }
  0x9c   :  { %v167_v48 = vmax.f32 %v143_v42, 0.0  ;;  %v171_v49 = vmax.f32 %v153_v43, 0.0 }
  0x9d   :  { %v160_v50 = vmax.f32 %v125_v46, 0.0  ;;  %v164_v51 = vmax.f32 %v135_v47, 0.0 }
  0x9e   :  { %184 = vst.msk [vmem:[%s376_s3 + $0x50] sm:$0xff] %vm173_vm1, %v167_v48 }
  0x9f   :  { %188 = vst.msk [vmem:[%s376_s3 + $0x70] sm:$0xff] %vm173_vm1, %v171_v49 }
  0xa0   :  { %177 = vst.msk [vmem:[%s376_s3 + $0x18] sm:$0xff] %vm173_vm1, %v160_v50 }
  0xa1   :  { %181 = vst.msk [vmem:[%s376_s3 + $0x38] sm:$0xff] %vm173_vm1, %v164_v51  ;;  %v144_v52 = vpop.f32.mrf.mxu2  ;;  %v154_v53 = vpop.f32.mrf.mxu3 }
  0xa2   :  { %v145_v54 = vadd.f32 %v250_v9, %v144_v52  ;;  %v155_v55 = vadd.f32 %v250_v9, %v154_v53 }
  0xa4   :  { %v168_v56 = vmax.f32 %v145_v54, 0.0  ;;  %v172_v57 = vmax.f32 %v155_v55, 0.0 }
  0xa6   :  { %185 = vst.msk [vmem:[%s376_s3 + $0x58] sm:$0xff] %vm173_vm1, %v168_v56 }
  0xa7   :  { %189 = vst.msk [vmem:[%s376_s3 + $0x78] sm:$0xff] %vm173_vm1, %v172_v57 }

// kernel: resneta_forward.24
= control target key start
LH: loop header
LB: loop body
LE: loop exit
PB: predicated region body
PF: predicated region fallthrough
CT: control target
= control target key end

     0   :  { %vm104_vm0 = vcmask 1041408   ;;  %vm79_vm1 = vcmask 31744   ;;  %vm205_vm2 = vcmask 130048   ;;  %s471_s1 = inlined_call_operand.vmem [shape: bf16[4,16], index: 1, kind: input, shape index: {}]   ;;  %s472_s0 = inlined_call_operand.vmem [shape: bf16[128,4], index: 0, kind: input, shape index: {}]   ;;  %s473_s2 = inlined_call_operand.vmem [shape: f32[1,16], index: 2, kind: input, shape index: {}]   ;;  %s474_s3 = inlined_call_operand.vmem [shape: f32[128,16], index: 3, kind: input, shape index: {}]   ;;  %s475_s4 = inlined_call_operand.vmem [shape: f32[128,16], index: 4, kind: output, shape index: {}]  }
   0x1   :  { %v34_v0 = vld [vmem:[%s471_s1] sm:$0x3]  ;;  %v268_v3 = vld [vmem:[%s472_s0 + $0x10] sm:$0xff]  ;;  %v267_v6 = vld [vmem:[%s472_s0 + $0x8] sm:$0xff] }
   0x2   :  { %v106_v1 = vsel %vm104_vm0, %v34_v0, 0  ;;  %v266_v2 = vld [vmem:[%s472_s0] sm:$0xff]  ;;  %v272_v5 = vld [vmem:[%s472_s0 + $0x30] sm:$0xff]  ;;  %v269_v7 = vld [vmem:[%s472_s0 + $0x18] sm:$0xff] }
   0x3   :  { %115 = vmatpush.bf16.msra.mxu0 %v106_v1  ;;  %274 = vmatpush.bf16.msra.mxu1 %v106_v1  ;;  %v270_v4 = vld [vmem:[%s472_s0 + $0x20] sm:$0xff]  ;;  %v271_v8 = vld [vmem:[%s472_s0 + $0x28] sm:$0xff]  ;;  %v273_v9 = vld [vmem:[%s472_s0 + $0x38] sm:$0xff] }
   0x4   :  { %275 = vmatpush.bf16.msra.mxu2 %v106_v1  ;;  %276 = vmatpush.bf16.msra.mxu3 %v106_v1  ;;  %v341_v10 = vld [vmem:[%s473_s2] ss:$0 sm:$0xff]  ;;  %v158_v28 = vld [vmem:[%s474_s3 + $0x8] sm:$0xff]  ;;  %v159_v48 = vld [vmem:[%s474_s3 + $0x10] sm:$0xff] }
   0x5   :  { %v157_v12 = vld [vmem:[%s474_s3] sm:$0xff]  ;;  %v162_v30 = vld [vmem:[%s474_s3 + $0x28] sm:$0xff]  ;;  %v163_v50 = vld [vmem:[%s474_s3 + $0x30] sm:$0xff] }
   0x6   :  { %258 = vmatmul.msk.bf16.vlgmr.msra.gmra.mxu0 %vm79_vm1, %v266_v2  ;;  %260 = vmatmul.msk.bf16.vlgmr.msra.gmra.mxu1 %vm79_vm1, %v268_v3  ;;  %v161_v14 = vld [vmem:[%s474_s3 + $0x20] sm:$0xff]  ;;  %v166_v42 = vld [vmem:[%s474_s3 + $0x48] sm:$0xff]  ;;  %v167_v62 = vld [vmem:[%s474_s3 + $0x50] sm:$0xff] }
   0x7   :  { %262 = vmatmul.msk.bf16.vlgmr.msra.gmra.mxu2 %vm79_vm1, %v270_v4  ;;  %264 = vmatmul.msk.bf16.vlgmr.msra.gmra.mxu3 %vm79_vm1, %v272_v5  ;;  %v165_v22 = vld [vmem:[%s474_s3 + $0x40] sm:$0xff]  ;;  %v170_v44 = vld [vmem:[%s474_s3 + $0x68] sm:$0xff]  ;;  %v171_v0 = vld [vmem:[%s474_s3 + $0x70] sm:$0xff] }
   0x8   :  { %v169_v24 = vld [vmem:[%s474_s3 + $0x60] sm:$0xff]  ;;  %v160_v4 = vld [vmem:[%s474_s3 + $0x18] sm:$0xff] }
  0x16   :  { %259 = vmatmul.msk.bf16.gmra.mxu0 %vm79_vm1, %v267_v6  ;;  %261 = vmatmul.msk.bf16.gmra.mxu1 %vm79_vm1, %v269_v7  ;;  %v164_v6 = vld [vmem:[%s474_s3 + $0x38] sm:$0xff] }
  0x17   :  { %263 = vmatmul.msk.bf16.gmra.mxu2 %vm79_vm1, %v271_v8  ;;  %265 = vmatmul.msk.bf16.gmra.mxu3 %vm79_vm1, %v273_v9 }
  0x83   :  { %v117_v11 = vpop.f32.mrf.mxu0  ;;  %v127_v13 = vpop.f32.mrf.mxu1 }
  0x84   :  { %v118_v15 = vadd.f32 %v341_v10, %v117_v11  ;;  %v128_v16 = vadd.f32 %v341_v10, %v127_v13 }
  0x86   :  { %v173_v17 = vadd.f32 %v157_v12, %v118_v15  ;;  %v177_v18 = vadd.f32 %v161_v14, %v128_v16 }
  0x88   :  { %v189_v19 = vmax.f32 %v173_v17, 0.0  ;;  %v193_v20 = vmax.f32 %v177_v18, 0.0 }
  0x8a   :  { %206 = vst.msk [vmem:[%s475_s4] sm:$0xff] %vm205_vm2, %v189_v19  ;;  %v137_v21 = vpop.f32.mrf.mxu2  ;;  %v147_v23 = vpop.f32.mrf.mxu3  ;;  %v168_v19 = vld [vmem:[%s474_s3 + $0x58] sm:$0xff] }
  0x8b   :  { %210 = vst.msk [vmem:[%s475_s4 + $0x20] sm:$0xff] %vm205_vm2, %v193_v20  ;;  %v138_v25 = vadd.f32 %v341_v10, %v137_v21  ;;  %v148_v26 = vadd.f32 %v341_v10, %v147_v23  ;;  %v119_v27 = vpop.f32.mrf.mxu0  ;;  %v129_v29 = vpop.f32.mrf.mxu1  ;;  %v172_v21 = vld [vmem:[%s474_s3 + $0x78] sm:$0xff] }
  0x8c   :  { %v120_v31 = vadd.f32 %v341_v10, %v119_v27  ;;  %v130_v32 = vadd.f32 %v341_v10, %v129_v29 }
  0x8d   :  { %v181_v33 = vadd.f32 %v165_v22, %v138_v25  ;;  %v185_v34 = vadd.f32 %v169_v24, %v148_v26 }
  0x8e   :  { %v174_v35 = vadd.f32 %v158_v28, %v120_v31  ;;  %v178_v36 = vadd.f32 %v162_v30, %v130_v32 }
  0x8f   :  { %v197_v37 = vmax.f32 %v181_v33, 0.0  ;;  %v201_v38 = vmax.f32 %v185_v34, 0.0 }
  0x90   :  { %v190_v39 = vmax.f32 %v174_v35, 0.0  ;;  %v194_v40 = vmax.f32 %v178_v36, 0.0 }
  0x91   :  { %214 = vst.msk [vmem:[%s475_s4 + $0x40] sm:$0xff] %vm205_vm2, %v197_v37 }
  0x92   :  { %218 = vst.msk [vmem:[%s475_s4 + $0x60] sm:$0xff] %vm205_vm2, %v201_v38  ;;  %v139_v41 = vpop.f32.mrf.mxu2  ;;  %v149_v43 = vpop.f32.mrf.mxu3 }
  0x93   :  { %207 = vst.msk [vmem:[%s475_s4 + $0x8] sm:$0xff] %vm205_vm2, %v190_v39  ;;  %v140_v45 = vadd.f32 %v341_v10, %v139_v41  ;;  %v150_v46 = vadd.f32 %v341_v10, %v149_v43  ;;  %v122_v47 = vpop.f32.mrf.mxu0  ;;  %v132_v49 = vpop.f32.mrf.mxu1 }
  0x94   :  { %211 = vst.msk [vmem:[%s475_s4 + $0x28] sm:$0xff] %vm205_vm2, %v194_v40  ;;  %v123_v51 = vadd.f32 %v341_v10, %v122_v47  ;;  %v133_v52 = vadd.f32 %v341_v10, %v132_v49 }
  0x95   :  { %v182_v53 = vadd.f32 %v166_v42, %v140_v45  ;;  %v186_v54 = vadd.f32 %v170_v44, %v150_v46 }
  0x96   :  { %v175_v55 = vadd.f32 %v159_v48, %v123_v51  ;;  %v179_v56 = vadd.f32 %v163_v50, %v133_v52 }
  0x97   :  { %v198_v57 = vmax.f32 %v182_v53, 0.0  ;;  %v202_v58 = vmax.f32 %v186_v54, 0.0 }
  0x98   :  { %v191_v59 = vmax.f32 %v175_v55, 0.0  ;;  %v195_v60 = vmax.f32 %v179_v56, 0.0 }
  0x99   :  { %215 = vst.msk [vmem:[%s475_s4 + $0x48] sm:$0xff] %vm205_vm2, %v198_v57 }
  0x9a   :  { %219 = vst.msk [vmem:[%s475_s4 + $0x68] sm:$0xff] %vm205_vm2, %v202_v58  ;;  %v142_v61 = vpop.f32.mrf.mxu2  ;;  %v152_v63 = vpop.f32.mrf.mxu3 }
  0x9b   :  { %208 = vst.msk [vmem:[%s475_s4 + $0x10] sm:$0xff] %vm205_vm2, %v191_v59  ;;  %v143_v1 = vadd.f32 %v341_v10, %v142_v61  ;;  %v153_v2 = vadd.f32 %v341_v10, %v152_v63  ;;  %v124_v3 = vpop.f32.mrf.mxu0  ;;  %v134_v5 = vpop.f32.mrf.mxu1 }
  0x9c   :  { %212 = vst.msk [vmem:[%s475_s4 + $0x30] sm:$0xff] %vm205_vm2, %v195_v60  ;;  %v125_v7 = vadd.f32 %v341_v10, %v124_v3  ;;  %v135_v8 = vadd.f32 %v341_v10, %v134_v5 }
  0x9d   :  { %v183_v9 = vadd.f32 %v167_v62, %v143_v1  ;;  %v187_v11 = vadd.f32 %v171_v0, %v153_v2 }
  0x9e   :  { %v176_v12 = vadd.f32 %v160_v4, %v125_v7  ;;  %v180_v13 = vadd.f32 %v164_v6, %v135_v8 }
  0x9f   :  { %v199_v14 = vmax.f32 %v183_v9, 0.0  ;;  %v203_v15 = vmax.f32 %v187_v11, 0.0 }
  0xa0   :  { %v192_v16 = vmax.f32 %v176_v12, 0.0  ;;  %v196_v17 = vmax.f32 %v180_v13, 0.0 }
  0xa1   :  { %216 = vst.msk [vmem:[%s475_s4 + $0x50] sm:$0xff] %vm205_vm2, %v199_v14 }
  0xa2   :  { %220 = vst.msk [vmem:[%s475_s4 + $0x70] sm:$0xff] %vm205_vm2, %v203_v15  ;;  %v144_v18 = vpop.f32.mrf.mxu2  ;;  %v154_v20 = vpop.f32.mrf.mxu3 }
  0xa3   :  { %209 = vst.msk [vmem:[%s475_s4 + $0x18] sm:$0xff] %vm205_vm2, %v192_v16  ;;  %v145_v22 = vadd.f32 %v341_v10, %v144_v18  ;;  %v155_v23 = vadd.f32 %v341_v10, %v154_v20 }
  0xa4   :  { %213 = vst.msk [vmem:[%s475_s4 + $0x38] sm:$0xff] %vm205_vm2, %v196_v17 }
  0xa5   :  { %v184_v24 = vadd.f32 %v168_v19, %v145_v22  ;;  %v188_v25 = vadd.f32 %v172_v21, %v155_v23 }
  0xa7   :  { %v200_v26 = vmax.f32 %v184_v24, 0.0  ;;  %v204_v27 = vmax.f32 %v188_v25, 0.0 }
  0xa9   :  { %217 = vst.msk [vmem:[%s475_s4 + $0x58] sm:$0xff] %vm205_vm2, %v200_v26 }
  0xaa   :  { %221 = vst.msk [vmem:[%s475_s4 + $0x78] sm:$0xff] %vm205_vm2, %v204_v27 }

// kernel: resneta_forward.23
= control target key start
LH: loop header
LB: loop body
LE: loop exit
PB: predicated region body
PF: predicated region fallthrough
CT: control target
= control target key end

     0   :  { %vm120_vm0 = vcmask 1041408   ;;  %vm95_vm1 = vcmask 293888   ;;  %vm189_vm2 = vcmask 31744   ;;  %s406_s1 = inlined_call_operand.vmem [shape: bf16[36,4], index: 1, kind: input, shape index: {}]   ;;  %s407_s2 = inlined_call_operand.vmem [shape: f32[1,4], index: 2, kind: input, shape index: {}]   ;;  %s408_s0 = inlined_call_operand.vmem [shape: bf16[128,36], index: 0, kind: input, shape index: {}]   ;;  %s409_s3 = inlined_call_operand.vmem [shape: f32[128,4], index: 3, kind: output, shape index: {}]  }
   0x1   :  { %v35_v0 = vld [vmem:[%s406_s1 + $0x10] sm:$0x3]  ;;  %v267_v4 = vld [vmem:[%s406_s1 + $0x8] sm:$0xff]  ;;  %v266_v5 = vld [vmem:[%s406_s1] sm:$0xff] }
   0x2   :  { %v89_v1 = vunpack.c.l.b16 %v35_v0  ;;  %v258_v6 = vld [vmem:[%s408_s0] sm:$0xff]  ;;  %v260_v7 = vld [vmem:[%s408_s0 + $0x10] sm:$0xff]  ;;  %v259_v10 = vld [vmem:[%s408_s0 + $0x8] sm:$0xff] }
   0x3   :  { %v262_v8 = vld [vmem:[%s408_s0 + $0x20] sm:$0xff]  ;;  %v264_v9 = vld [vmem:[%s408_s0 + $0x30] sm:$0xff]  ;;  %v261_v11 = vld [vmem:[%s408_s0 + $0x18] sm:$0xff] }
   0x4   :  { %v92_v2 = vpack.c.b16 %v89_v1, %v89_v1  ;;  %v263_v12 = vld [vmem:[%s408_s0 + $0x28] sm:$0xff]  ;;  %v265_v13 = vld [vmem:[%s408_s0 + $0x38] sm:$0xff]  ;;  %v277_v14 = vld [vmem:[%s407_s2] ss:$0 sm:$0xff] }
   0x6   :  { %v122_v3 = vsel %vm120_vm0, %v92_v2, 0 }
   0x7   :  { %129 = vmatpush.bf16.msra.mxu0 %v122_v3  ;;  %268 = vmatpush.bf16.msra.mxu1 %v122_v3 }
   0x8   :  { %269 = vmatpush.bf16.msra.mxu2 %v122_v3  ;;  %270 = vmatpush.bf16.msra.mxu3 %v122_v3 }
   0xb   :  { %130 = vmatpush.bf16.msra.mxu0 %v267_v4  ;;  %271 = vmatpush.bf16.msra.mxu1 %v267_v4 }
   0xc   :  { %272 = vmatpush.bf16.msra.mxu2 %v267_v4  ;;  %273 = vmatpush.bf16.msra.mxu3 %v267_v4 }
   0xf   :  { %131 = vmatpush.bf16.msra.mxu0 %v266_v5  ;;  %274 = vmatpush.bf16.msra.mxu1 %v266_v5 }
  0x10   :  { %275 = vmatpush.bf16.msra.mxu2 %v266_v5  ;;  %276 = vmatpush.bf16.msra.mxu3 %v266_v5 }
  0x12   :  { %250 = vmatmul.msk.bf16.vlgmr.msra.gmra.mxu0 %vm95_vm1, %v258_v6  ;;  %252 = vmatmul.msk.bf16.vlgmr.msra.gmra.mxu1 %vm95_vm1, %v260_v7 }
  0x13   :  { %254 = vmatmul.msk.bf16.vlgmr.msra.gmra.mxu2 %vm95_vm1, %v262_v8  ;;  %256 = vmatmul.msk.bf16.vlgmr.msra.gmra.mxu3 %vm95_vm1, %v264_v9 }
  0x22   :  { %251 = vmatmul.msk.bf16.gmra.mxu0 %vm95_vm1, %v259_v10  ;;  %253 = vmatmul.msk.bf16.gmra.mxu1 %vm95_vm1, %v261_v11 }
  0x23   :  { %255 = vmatmul.msk.bf16.gmra.mxu2 %vm95_vm1, %v263_v12  ;;  %257 = vmatmul.msk.bf16.gmra.mxu3 %vm95_vm1, %v265_v13 }
  0x8f   :  { %v133_v15 = vpop.f32.mrf.mxu0  ;;  %v143_v16 = vpop.f32.mrf.mxu1 }
  0x90   :  { %v134_v17 = vadd.f32 %v277_v14, %v133_v15  ;;  %v144_v18 = vadd.f32 %v277_v14, %v143_v16 }
  0x92   :  { %v173_v19 = vmax.f32 %v134_v17, 0.0  ;;  %v177_v20 = vmax.f32 %v144_v18, 0.0 }
  0x94   :  { %190 = vst.msk [vmem:[%s409_s3] sm:$0xff] %vm189_vm2, %v173_v19 }
  0x95   :  { %194 = vst.msk [vmem:[%s409_s3 + $0x20] sm:$0xff] %vm189_vm2, %v177_v20 }
  0x96   :  { %v153_v21 = vpop.f32.mrf.mxu2  ;;  %v163_v22 = vpop.f32.mrf.mxu3 }
  0x97   :  { %v154_v23 = vadd.f32 %v277_v14, %v153_v21  ;;  %v164_v24 = vadd.f32 %v277_v14, %v163_v22  ;;  %v135_v25 = vpop.f32.mrf.mxu0  ;;  %v145_v26 = vpop.f32.mrf.mxu1 }
  0x98   :  { %v136_v27 = vadd.f32 %v277_v14, %v135_v25  ;;  %v146_v28 = vadd.f32 %v277_v14, %v145_v26 }
  0x99   :  { %v181_v29 = vmax.f32 %v154_v23, 0.0  ;;  %v185_v30 = vmax.f32 %v164_v24, 0.0 }
  0x9a   :  { %v174_v31 = vmax.f32 %v136_v27, 0.0  ;;  %v178_v32 = vmax.f32 %v146_v28, 0.0 }
  0x9b   :  { %198 = vst.msk [vmem:[%s409_s3 + $0x40] sm:$0xff] %vm189_vm2, %v181_v29 }
  0x9c   :  { %202 = vst.msk [vmem:[%s409_s3 + $0x60] sm:$0xff] %vm189_vm2, %v185_v30 }
  0x9d   :  { %191 = vst.msk [vmem:[%s409_s3 + $0x8] sm:$0xff] %vm189_vm2, %v174_v31 }
  0x9e   :  { %195 = vst.msk [vmem:[%s409_s3 + $0x28] sm:$0xff] %vm189_vm2, %v178_v32  ;;  %v155_v33 = vpop.f32.mrf.mxu2  ;;  %v165_v34 = vpop.f32.mrf.mxu3 }
  0x9f   :  { %v156_v35 = vadd.f32 %v277_v14, %v155_v33  ;;  %v166_v36 = vadd.f32 %v277_v14, %v165_v34  ;;  %v138_v37 = vpop.f32.mrf.mxu0  ;;  %v148_v38 = vpop.f32.mrf.mxu1 }
  0xa0   :  { %v139_v39 = vadd.f32 %v277_v14, %v138_v37  ;;  %v149_v40 = vadd.f32 %v277_v14, %v148_v38 }
  0xa1   :  { %v182_v41 = vmax.f32 %v156_v35, 0.0  ;;  %v186_v42 = vmax.f32 %v166_v36, 0.0 }
  0xa2   :  { %v175_v43 = vmax.f32 %v139_v39, 0.0  ;;  %v179_v44 = vmax.f32 %v149_v40, 0.0 }
  0xa3   :  { %199 = vst.msk [vmem:[%s409_s3 + $0x48] sm:$0xff] %vm189_vm2, %v182_v41 }
  0xa4   :  { %203 = vst.msk [vmem:[%s409_s3 + $0x68] sm:$0xff] %vm189_vm2, %v186_v42 }
  0xa5   :  { %192 = vst.msk [vmem:[%s409_s3 + $0x10] sm:$0xff] %vm189_vm2, %v175_v43 }
  0xa6   :  { %196 = vst.msk [vmem:[%s409_s3 + $0x30] sm:$0xff] %vm189_vm2, %v179_v44  ;;  %v158_v45 = vpop.f32.mrf.mxu2  ;;  %v168_v46 = vpop.f32.mrf.mxu3 }
  0xa7   :  { %v159_v47 = vadd.f32 %v277_v14, %v158_v45  ;;  %v169_v48 = vadd.f32 %v277_v14, %v168_v46  ;;  %v140_v49 = vpop.f32.mrf.mxu0  ;;  %v150_v50 = vpop.f32.mrf.mxu1 }
  0xa8   :  { %v141_v51 = vadd.f32 %v277_v14, %v140_v49  ;;  %v151_v52 = vadd.f32 %v277_v14, %v150_v50 }
  0xa9   :  { %v183_v53 = vmax.f32 %v159_v47, 0.0  ;;  %v187_v54 = vmax.f32 %v169_v48, 0.0 }
  0xaa   :  { %v176_v55 = vmax.f32 %v141_v51, 0.0  ;;  %v180_v56 = vmax.f32 %v151_v52, 0.0 }
  0xab   :  { %200 = vst.msk [vmem:[%s409_s3 + $0x50] sm:$0xff] %vm189_vm2, %v183_v53 }
  0xac   :  { %204 = vst.msk [vmem:[%s409_s3 + $0x70] sm:$0xff] %vm189_vm2, %v187_v54 }
  0xad   :  { %193 = vst.msk [vmem:[%s409_s3 + $0x18] sm:$0xff] %vm189_vm2, %v176_v55 }
  0xae   :  { %197 = vst.msk [vmem:[%s409_s3 + $0x38] sm:$0xff] %vm189_vm2, %v180_v56  ;;  %v160_v57 = vpop.f32.mrf.mxu2  ;;  %v170_v58 = vpop.f32.mrf.mxu3 }
  0xaf   :  { %v161_v59 = vadd.f32 %v277_v14, %v160_v57  ;;  %v171_v60 = vadd.f32 %v277_v14, %v170_v58 }
  0xb1   :  { %v184_v61 = vmax.f32 %v161_v59, 0.0  ;;  %v188_v62 = vmax.f32 %v171_v60, 0.0 }
  0xb3   :  { %201 = vst.msk [vmem:[%s409_s3 + $0x58] sm:$0xff] %vm189_vm2, %v184_v61 }
  0xb4   :  { %205 = vst.msk [vmem:[%s409_s3 + $0x78] sm:$0xff] %vm189_vm2, %v188_v62 }

// kernel: resneta_forward.28
= control target key start
LH: loop header
LB: loop body
LE: loop exit
PB: predicated region body
PF: predicated region fallthrough
CT: control target
= control target key end

     0   :  { %vm65_vm0 = vcmask 523264   ;;  %vm91_vm1 = vcmask 261120   ;;  %s190_s1 = inlined_call_operand.vmem [shape: bf16[64,32], index: 1, kind: input, shape index: {}]   ;;  %s191_s2 = inlined_call_operand.vmem [shape: f32[1,32], index: 2, kind: input, shape index: {}]   ;;  %s192_s0 = inlined_call_operand.vmem [shape: bf16[32,64], index: 0, kind: input, shape index: {}]   ;;  %s193_s3 = inlined_call_operand.vmem [shape: f32[32,32], index: 3, kind: output, shape index: {}]  }
   0x1   :  { %v131_v0 = vld [vmem:[%s190_s1 + $0x18] sm:$0xff]  ;;  %v130_v1 = vld [vmem:[%s190_s1 + $0x10] sm:$0xff]  ;;  %v129_v2 = vld [vmem:[%s190_s1 + $0x8] sm:$0xff] }
   0x2   :  { %76 = vmatpush.bf16.msra.mxu0 %v131_v0  ;;  %132 = vmatpush.bf16.msra.mxu1 %v131_v0  ;;  %v128_v3 = vld [vmem:[%s190_s1] sm:$0xff]  ;;  %v127_v5 = vld [vmem:[%s192_s0 + $0x8] sm:$0xff] }
   0x3   :  { %v126_v4 = vld [vmem:[%s192_s0] sm:$0xff] }
   0x4   :  { %v136_v6 = vld [vmem:[%s191_s2] ss:$0 sm:$0xff] }
   0x6   :  { %77 = vmatpush.bf16.msra.mxu0 %v130_v1  ;;  %133 = vmatpush.bf16.msra.mxu1 %v130_v1 }
   0xa   :  { %78 = vmatpush.bf16.msra.mxu0 %v129_v2  ;;  %134 = vmatpush.bf16.msra.mxu1 %v129_v2 }
   0xe   :  { %79 = vmatpush.bf16.msra.mxu0 %v128_v3  ;;  %135 = vmatpush.bf16.msra.mxu1 %v128_v3 }
  0x11   :  { %124 = vmatmul.msk.bf16.vlgmr.msra.gmra.mxu0 %vm65_vm0, %v126_v4  ;;  %125 = vmatmul.msk.bf16.vlgmr.msra.gmra.mxu1 %vm65_vm0, %v127_v5 }
  0x8e   :  { %v81_v7 = vpop.f32.mrf.mxu0  ;;  %v86_v8 = vpop.f32.mrf.mxu1 }
  0x8f   :  { %v82_v9 = vadd.f32 %v136_v6, %v81_v7  ;;  %v87_v10 = vadd.f32 %v136_v6, %v86_v8 }
  0x91   :  { %92 = vst.msk [vmem:[%s193_s3] sm:$0xff] %vm91_vm1, %v82_v9 }
  0x92   :  { %94 = vst.msk [vmem:[%s193_s3 + $0x10] sm:$0xff] %vm91_vm1, %v87_v10 }
  0x96   :  { %v83_v11 = vpop.f32.mrf.mxu0  ;;  %v88_v12 = vpop.f32.mrf.mxu1 }
  0x97   :  { %v84_v13 = vadd.f32 %v136_v6, %v83_v11  ;;  %v89_v14 = vadd.f32 %v136_v6, %v88_v12 }
  0x99   :  { %93 = vst.msk [vmem:[%s193_s3 + $0x8] sm:$0xff] %vm91_vm1, %v84_v13 }
  0x9a   :  { %95 = vst.msk [vmem:[%s193_s3 + $0x18] sm:$0xff] %vm91_vm1, %v89_v14 }

// kernel: resneta_forward.29
= control target key start
LH: loop header
LB: loop body
LE: loop exit
PB: predicated region body
PF: predicated region fallthrough
CT: control target
= control target key end

     0   :  { %vm83_vm0 = vcmask 130048   ;;  %vm173_vm1 = vcmask 64512   ;;  %s373_s1 = inlined_call_operand.vmem [shape: bf16[16,8], index: 1, kind: input, shape index: {}]   ;;  %s374_s0 = inlined_call_operand.vmem [shape: bf16[128,16], index: 0, kind: input, shape index: {}]   ;;  %s375_s2 = inlined_call_operand.vmem [shape: f32[1,8], index: 2, kind: input, shape index: {}]   ;;  %s376_s3 = inlined_call_operand.vmem [shape: f32[128,8], index: 3, kind: output, shape index: {}]  }
   0x1   :  { %v246_v0 = vld [vmem:[%s373_s1] sm:$0xff]  ;;  %v240_v2 = vld [vmem:[%s374_s0 + $0x10] sm:$0xff]  ;;  %v239_v5 = vld [vmem:[%s374_s0 + $0x8] sm:$0xff] }
   0x2   :  { %v238_v1 = vld [vmem:[%s374_s0] sm:$0xff]  ;;  %115 = vmatpush.bf16.msra.mxu0 %v246_v0  ;;  %247 = vmatpush.bf16.msra.mxu1 %v246_v0  ;;  %v244_v4 = vld [vmem:[%s374_s0 + $0x30] sm:$0xff]  ;;  %v241_v6 = vld [vmem:[%s374_s0 + $0x18] sm:$0xff] }
   0x3   :  { %v242_v3 = vld [vmem:[%s374_s0 + $0x20] sm:$0xff]  ;;  %248 = vmatpush.bf16.msra.mxu2 %v246_v0  ;;  %249 = vmatpush.bf16.msra.mxu3 %v246_v0  ;;  %v243_v7 = vld [vmem:[%s374_s0 + $0x28] sm:$0xff]  ;;  %v245_v8 = vld [vmem:[%s374_s0 + $0x38] sm:$0xff] }
   0x4   :  { %v250_v9 = vld [vmem:[%s375_s2] ss:$0 sm:$0xff] }
   0x5   :  { %230 = vmatmul.msk.bf16.vlgmr.msra.gmra.mxu0 %vm83_vm0, %v238_v1  ;;  %232 = vmatmul.msk.bf16.vlgmr.msra.gmra.mxu1 %vm83_vm0, %v240_v2 }
   0x6   :  { %234 = vmatmul.msk.bf16.vlgmr.msra.gmra.mxu2 %vm83_vm0, %v242_v3  ;;  %236 = vmatmul.msk.bf16.vlgmr.msra.gmra.mxu3 %vm83_vm0, %v244_v4 }
  0x15   :  { %231 = vmatmul.msk.bf16.gmra.mxu0 %vm83_vm0, %v239_v5  ;;  %233 = vmatmul.msk.bf16.gmra.mxu1 %vm83_vm0, %v241_v6 }
  0x16   :  { %235 = vmatmul.msk.bf16.gmra.mxu2 %vm83_vm0, %v243_v7  ;;  %237 = vmatmul.msk.bf16.gmra.mxu3 %vm83_vm0, %v245_v8 }
  0x82   :  { %v117_v10 = vpop.f32.mrf.mxu0  ;;  %v127_v11 = vpop.f32.mrf.mxu1 }
  0x83   :  { %v118_v12 = vadd.f32 %v250_v9, %v117_v10  ;;  %v128_v13 = vadd.f32 %v250_v9, %v127_v11 }
  0x85   :  { %v157_v14 = vmax.f32 %v118_v12, 0.0  ;;  %v161_v15 = vmax.f32 %v128_v13, 0.0 }
  0x87   :  { %174 = vst.msk [vmem:[%s376_s3] sm:$0xff] %vm173_vm1, %v157_v14 }
  0x88   :  { %178 = vst.msk [vmem:[%s376_s3 + $0x20] sm:$0xff] %vm173_vm1, %v161_v15 }
  0x89   :  { %v137_v16 = vpop.f32.mrf.mxu2  ;;  %v147_v17 = vpop.f32.mrf.mxu3 }
  0x8a   :  { %v138_v18 = vadd.f32 %v250_v9, %v137_v16  ;;  %v148_v19 = vadd.f32 %v250_v9, %v147_v17  ;;  %v119_v20 = vpop.f32.mrf.mxu0  ;;  %v129_v21 = vpop.f32.mrf.mxu1 }
  0x8b   :  { %v120_v22 = vadd.f32 %v250_v9, %v119_v20  ;;  %v130_v23 = vadd.f32 %v250_v9, %v129_v21 }
  0x8c   :  { %v165_v24 = vmax.f32 %v138_v18, 0.0  ;;  %v169_v25 = vmax.f32 %v148_v19, 0.0 }
  0x8d   :  { %v158_v26 = vmax.f32 %v120_v22, 0.0  ;;  %v162_v27 = vmax.f32 %v130_v23, 0.0 }
  0x8e   :  { %182 = vst.msk [vmem:[%s376_s3 + $0x40] sm:$0xff] %vm173_vm1, %v165_v24 }
  0x8f   :  { %186 = vst.msk [vmem:[%s376_s3 + $0x60] sm:$0xff] %vm173_vm1, %v169_v25 }
  0x90   :  { %175 = vst.msk [vmem:[%s376_s3 + $0x8] sm:$0xff] %vm173_vm1, %v158_v26 }
  0x91   :  { %179 = vst.msk [vmem:[%s376_s3 + $0x28] sm:$0xff] %vm173_vm1, %v162_v27  ;;  %v139_v28 = vpop.f32.mrf.mxu2  ;;  %v149_v29 = vpop.f32.mrf.mxu3 }
  0x92   :  { %v140_v30 = vadd.f32 %v250_v9, %v139_v28  ;;  %v150_v31 = vadd.f32 %v250_v9, %v149_v29  ;;  %v122_v32 = vpop.f32.mrf.mxu0  ;;  %v132_v33 = vpop.f32.mrf.mxu1 }
  0x93   :  { %v123_v34 = vadd.f32 %v250_v9, %v122_v32  ;;  %v133_v35 = vadd.f32 %v250_v9, %v132_v33 }
  0x94   :  { %v166_v36 = vmax.f32 %v140_v30, 0.0  ;;  %v170_v37 = vmax.f32 %v150_v31, 0.0 }
  0x95   :  { %v159_v38 = vmax.f32 %v123_v34, 0.0  ;;  %v163_v39 = vmax.f32 %v133_v35, 0.0 }
  0x96   :  { %183 = vst.msk [vmem:[%s376_s3 + $0x48] sm:$0xff] %vm173_vm1, %v166_v36 }
  0x97   :  { %187 = vst.msk [vmem:[%s376_s3 + $0x68] sm:$0xff] %vm173_vm1, %v170_v37 }
  0x98   :  { %176 = vst.msk [vmem:[%s376_s3 + $0x10] sm:$0xff] %vm173_vm1, %v159_v38 }
  0x99   :  { %180 = vst.msk [vmem:[%s376_s3 + $0x30] sm:$0xff] %vm173_vm1, %v163_v39  ;;  %v142_v40 = vpop.f32.mrf.mxu2  ;;  %v152_v41 = vpop.f32.mrf.mxu3 }
  0x9a   :  { %v143_v42 = vadd.f32 %v250_v9, %v142_v40  ;;  %v153_v43 = vadd.f32 %v250_v9, %v152_v41  ;;  %v124_v44 = vpop.f32.mrf.mxu0  ;;  %v134_v45 = vpop.f32.mrf.mxu1 }
  0x9b   :  { %v125_v46 = vadd.f32 %v250_v9, %v124_v44  ;;  %v135_v47 = vadd.f32 %v250_v9, %v134_v45 }
  0x9c   :  { %v167_v48 = vmax.f32 %v143_v42, 0.0  ;;  %v171_v49 = vmax.f32 %v153_v43, 0.0 }
  0x9d   :  { %v160_v50 = vmax.f32 %v125_v46, 0.0  ;;  %v164_v51 = vmax.f32 %v135_v47, 0.0 }
  0x9e   :  { %184 = vst.msk [vmem:[%s376_s3 + $0x50] sm:$0xff] %vm173_vm1, %v167_v48 }
  0x9f   :  { %188 = vst.msk [vmem:[%s376_s3 + $0x70] sm:$0xff] %vm173_vm1, %v171_v49 }
  0xa0   :  { %177 = vst.msk [vmem:[%s376_s3 + $0x18] sm:$0xff] %vm173_vm1, %v160_v50 }
  0xa1   :  { %181 = vst.msk [vmem:[%s376_s3 + $0x38] sm:$0xff] %vm173_vm1, %v164_v51  ;;  %v144_v52 = vpop.f32.mrf.mxu2  ;;  %v154_v53 = vpop.f32.mrf.mxu3 }
  0xa2   :  { %v145_v54 = vadd.f32 %v250_v9, %v144_v52  ;;  %v155_v55 = vadd.f32 %v250_v9, %v154_v53 }
  0xa4   :  { %v168_v56 = vmax.f32 %v145_v54, 0.0  ;;  %v172_v57 = vmax.f32 %v155_v55, 0.0 }
  0xa6   :  { %185 = vst.msk [vmem:[%s376_s3 + $0x58] sm:$0xff] %vm173_vm1, %v168_v56 }
  0xa7   :  { %189 = vst.msk [vmem:[%s376_s3 + $0x78] sm:$0xff] %vm173_vm1, %v172_v57 }

// kernel: resneta_forward.30
= control target key start
LH: loop header
LB: loop body
LE: loop exit
PB: predicated region body
PF: predicated region fallthrough
CT: control target
= control target key end

     0   :  { %vm76_vm0 = vcmask 1043456   ;;  %vm69_vm1 = vcmask 588800   ;;  %vm103_vm2 = vcmask 64512   ;;  %s206_s1 = inlined_call_operand.vmem [shape: bf16[72,8], index: 1, kind: input, shape index: {}]   ;;  %s207_s2 = inlined_call_operand.vmem [shape: f32[1,8], index: 2, kind: input, shape index: {}]   ;;  %s208_s0 = inlined_call_operand.vmem [shape: bf16[32,72], index: 0, kind: input, shape index: {}]   ;;  %s209_s3 = inlined_call_operand.vmem [shape: f32[32,8], index: 3, kind: output, shape index: {}]  }
   0x1   :  { %v27_v0 = vld [vmem:[%s206_s1 + $0x20] sm:$0xf]  ;;  %v143_v4 = vld [vmem:[%s206_s1 + $0x18] sm:$0xff]  ;;  %v142_v5 = vld [vmem:[%s206_s1 + $0x10] sm:$0xff] }
   0x2   :  { %v59_v1 = vunpack.c.l.b16 %v27_v0  ;;  %v141_v6 = vld [vmem:[%s206_s1 + $0x8] sm:$0xff]  ;;  %v140_v7 = vld [vmem:[%s206_s1] sm:$0xff] }
   0x3   :  { %v138_v8 = vld [vmem:[%s208_s0] sm:$0xff]  ;;  %v139_v9 = vld [vmem:[%s208_s0 + $0x8] sm:$0xff] }
   0x4   :  { %v64_v2 = vpack.c.b16 %v59_v1, %v59_v1  ;;  %v149_v10 = vld [vmem:[%s207_s2] ss:$0 sm:$0xff] }
   0x6   :  { %v78_v3 = vsel %vm76_vm0, %v64_v2, 0 }
   0x7   :  { %83 = vmatpush.bf16.msra.mxu0 %v78_v3  ;;  %144 = vmatpush.bf16.msra.mxu1 %v78_v3 }
   0xb   :  { %84 = vmatpush.bf16.msra.mxu0 %v143_v4  ;;  %145 = vmatpush.bf16.msra.mxu1 %v143_v4 }
   0xf   :  { %85 = vmatpush.bf16.msra.mxu0 %v142_v5  ;;  %146 = vmatpush.bf16.msra.mxu1 %v142_v5 }
  0x13   :  { %86 = vmatpush.bf16.msra.mxu0 %v141_v6  ;;  %147 = vmatpush.bf16.msra.mxu1 %v141_v6 }
  0x17   :  { %87 = vmatpush.bf16.msra.mxu0 %v140_v7  ;;  %148 = vmatpush.bf16.msra.mxu1 %v140_v7 }
  0x1a   :  { %136 = vmatmul.msk.bf16.vlgmr.msra.gmra.mxu0 %vm69_vm1, %v138_v8  ;;  %137 = vmatmul.msk.bf16.vlgmr.msra.gmra.mxu1 %vm69_vm1, %v139_v9 }
  0x97   :  { %v89_v11 = vpop.f32.mrf.mxu0  ;;  %v94_v12 = vpop.f32.mrf.mxu1 }
  0x98   :  { %v90_v13 = vadd.f32 %v149_v10, %v89_v11  ;;  %v95_v14 = vadd.f32 %v149_v10, %v94_v12 }
  0x9a   :  { %v99_v15 = vmax.f32 %v90_v13, 0.0  ;;  %v101_v16 = vmax.f32 %v95_v14, 0.0 }
  0x9c   :  { %104 = vst.msk [vmem:[%s209_s3] sm:$0xff] %vm103_vm2, %v99_v15 }
  0x9d   :  { %106 = vst.msk [vmem:[%s209_s3 + $0x10] sm:$0xff] %vm103_vm2, %v101_v16 }
  0x9f   :  { %v91_v17 = vpop.f32.mrf.mxu0  ;;  %v96_v18 = vpop.f32.mrf.mxu1 }
  0xa0   :  { %v92_v19 = vadd.f32 %v149_v10, %v91_v17  ;;  %v97_v20 = vadd.f32 %v149_v10, %v96_v18 }
  0xa2   :  { %v100_v21 = vmax.f32 %v92_v19, 0.0  ;;  %v102_v22 = vmax.f32 %v97_v20, 0.0 }
  0xa4   :  { %105 = vst.msk [vmem:[%s209_s3 + $0x8] sm:$0xff] %vm103_vm2, %v100_v21 }
  0xa5   :  { %107 = vst.msk [vmem:[%s209_s3 + $0x18] sm:$0xff] %vm103_vm2, %v102_v22 }

// kernel: resneta_forward.31
= control target key start
LH: loop header
LB: loop body
LE: loop exit
PB: predicated region body
PF: predicated region fallthrough
CT: control target
= control target key end

     0   :  { %vm44_vm0 = vcmask 1043456   ;;  %vm37_vm1 = vcmask 64512   ;;  %vm79_vm2 = vcmask 261120   ;;  %s167_s1 = inlined_call_operand.vmem [shape: bf16[8,32], index: 1, kind: input, shape index: {}]   ;;  %s168_s0 = inlined_call_operand.vmem [shape: bf16[32,8], index: 0, kind: input, shape index: {}]   ;;  %s169_s2 = inlined_call_operand.vmem [shape: f32[1,32], index: 2, kind: input, shape index: {}]   ;;  %s170_s3 = inlined_call_operand.vmem [shape: f32[32,32], index: 3, kind: input, shape index: {}]   ;;  %s171_s4 = inlined_call_operand.vmem [shape: f32[32,32], index: 4, kind: output, shape index: {}]  }
   0x1   :  { %v22_v0 = vld [vmem:[%s167_s1] sm:$0xf]  ;;  %v99_v3 = vld [vmem:[%s168_s0 + $0x8] sm:$0xff]  ;;  %v69_v8 = vld [vmem:[%s170_s3 + $0x10] sm:$0xff] }
   0x2   :  { %v46_v1 = vsel %vm44_vm0, %v22_v0, 0  ;;  %v98_v2 = vld [vmem:[%s168_s0] sm:$0xff]  ;;  %v68_v16 = vld [vmem:[%s170_s3 + $0x8] sm:$0xff]  ;;  %v70_v18 = vld [vmem:[%s170_s3 + $0x18] sm:$0xff] }
   0x3   :  { %55 = vmatpush.bf16.msra.mxu0 %v46_v1  ;;  %100 = vmatpush.bf16.msra.mxu1 %v46_v1  ;;  %v101_v4 = vld [vmem:[%s169_s2] ss:$0 sm:$0xff] }
   0x4   :  { %v67_v6 = vld [vmem:[%s170_s3] sm:$0xff] }
   0x6   :  { %96 = vmatmul.msk.bf16.vlgmr.msra.gmra.mxu0 %vm37_vm1, %v98_v2  ;;  %97 = vmatmul.msk.bf16.vlgmr.msra.gmra.mxu1 %vm37_vm1, %v99_v3 }
  0x83   :  { %v57_v5 = vpop.f32.mrf.mxu0  ;;  %v62_v7 = vpop.f32.mrf.mxu1 }
  0x84   :  { %v58_v9 = vadd.f32 %v101_v4, %v57_v5  ;;  %v63_v10 = vadd.f32 %v101_v4, %v62_v7 }
  0x86   :  { %v71_v11 = vadd.f32 %v67_v6, %v58_v9  ;;  %v73_v12 = vadd.f32 %v69_v8, %v63_v10 }
  0x88   :  { %v75_v13 = vmax.f32 %v71_v11, 0.0  ;;  %v77_v14 = vmax.f32 %v73_v12, 0.0 }
  0x8a   :  { %80 = vst.msk [vmem:[%s171_s4] sm:$0xff] %vm79_vm2, %v75_v13 }
  0x8b   :  { %82 = vst.msk [vmem:[%s171_s4 + $0x10] sm:$0xff] %vm79_vm2, %v77_v14  ;;  %v59_v15 = vpop.f32.mrf.mxu0  ;;  %v64_v17 = vpop.f32.mrf.mxu1 }
  0x8c   :  { %v60_v19 = vadd.f32 %v101_v4, %v59_v15  ;;  %v65_v20 = vadd.f32 %v101_v4, %v64_v17 }
  0x8e   :  { %v72_v21 = vadd.f32 %v68_v16, %v60_v19  ;;  %v74_v22 = vadd.f32 %v70_v18, %v65_v20 }
  0x90   :  { %v76_v23 = vmax.f32 %v72_v21, 0.0  ;;  %v78_v24 = vmax.f32 %v74_v22, 0.0 }
  0x92   :  { %81 = vst.msk [vmem:[%s171_s4 + $0x8] sm:$0xff] %vm79_vm2, %v76_v23 }
  0x93   :  { %83 = vst.msk [vmem:[%s171_s4 + $0x18] sm:$0xff] %vm79_vm2, %v78_v24 }

// kernel: resneta_forward.32
= control target key start
LH: loop header
LB: loop body
LE: loop exit
PB: predicated region body
PF: predicated region fallthrough
CT: control target
= control target key end

     0   :  { %vm49_vm0 = vcmask 261120   ;;  %vm79_vm1 = vcmask 64512   ;;  %s160_s1 = inlined_call_operand.vmem [shape: bf16[32,8], index: 1, kind: input, shape index: {}]   ;;  %s161_s2 = inlined_call_operand.vmem [shape: f32[1,8], index: 2, kind: input, shape index: {}]   ;;  %s162_s0 = inlined_call_operand.vmem [shape: bf16[32,32], index: 0, kind: input, shape index: {}]   ;;  %s163_s3 = inlined_call_operand.vmem [shape: f32[32,8], index: 3, kind: output, shape index: {}]  }
   0x1   :  { %v109_v0 = vld [vmem:[%s160_s1 + $0x8] sm:$0xff]  ;;  %v108_v1 = vld [vmem:[%s160_s1] sm:$0xff] }
   0x2   :  { %62 = vmatpush.bf16.msra.mxu0 %v109_v0  ;;  %110 = vmatpush.bf16.msra.mxu1 %v109_v0  ;;  %v106_v2 = vld [vmem:[%s162_s0] sm:$0xff]  ;;  %v107_v3 = vld [vmem:[%s162_s0 + $0x8] sm:$0xff] }
   0x3   :  { %v112_v4 = vld [vmem:[%s161_s2] ss:$0 sm:$0xff] }
   0x6   :  { %63 = vmatpush.bf16.msra.mxu0 %v108_v1  ;;  %111 = vmatpush.bf16.msra.mxu1 %v108_v1 }
   0x9   :  { %104 = vmatmul.msk.bf16.vlgmr.msra.gmra.mxu0 %vm49_vm0, %v106_v2  ;;  %105 = vmatmul.msk.bf16.vlgmr.msra.gmra.mxu1 %vm49_vm0, %v107_v3 }
  0x86   :  { %v65_v5 = vpop.f32.mrf.mxu0  ;;  %v70_v6 = vpop.f32.mrf.mxu1 }
  0x87   :  { %v66_v7 = vadd.f32 %v112_v4, %v65_v5  ;;  %v71_v8 = vadd.f32 %v112_v4, %v70_v6 }
  0x89   :  { %v75_v9 = vmax.f32 %v66_v7, 0.0  ;;  %v77_v10 = vmax.f32 %v71_v8, 0.0 }
  0x8b   :  { %80 = vst.msk [vmem:[%s163_s3] sm:$0xff] %vm79_vm1, %v75_v9 }
  0x8c   :  { %82 = vst.msk [vmem:[%s163_s3 + $0x10] sm:$0xff] %vm79_vm1, %v77_v10 }
  0x8e   :  { %v67_v11 = vpop.f32.mrf.mxu0  ;;  %v72_v12 = vpop.f32.mrf.mxu1 }
  0x8f   :  { %v68_v13 = vadd.f32 %v112_v4, %v67_v11  ;;  %v73_v14 = vadd.f32 %v112_v4, %v72_v12 }
  0x91   :  { %v76_v15 = vmax.f32 %v68_v13, 0.0  ;;  %v78_v16 = vmax.f32 %v73_v14, 0.0 }
  0x93   :  { %81 = vst.msk [vmem:[%s163_s3 + $0x8] sm:$0xff] %vm79_vm1, %v76_v15 }
  0x94   :  { %83 = vst.msk [vmem:[%s163_s3 + $0x18] sm:$0xff] %vm79_vm1, %v78_v16 }

// kernel: resneta_forward.35
= control target key start
LH: loop header
LB: loop body
LE: loop exit
PB: predicated region body
PF: predicated region fallthrough
CT: control target
= control target key end

     0   :  { %vm49_vm0 = vcmask 261120   ;;  %vm75_vm1 = vcmask 80896   ;;  %s156_s1 = inlined_call_operand.vmem [shape: bf16[32,10], index: 1, kind: input, shape index: {}]   ;;  %s157_s2 = inlined_call_operand.vmem [shape: f32[1,10], index: 2, kind: input, shape index: {}]   ;;  %s158_s0 = inlined_call_operand.vmem [shape: bf16[32,32], index: 0, kind: input, shape index: {}]   ;;  %s159_s3 = inlined_call_operand.vmem [shape: f32[32,10], index: 3, kind: output, shape index: {}]  }
   0x1   :  { %v105_v0 = vld [vmem:[%s156_s1 + $0x8] sm:$0xff]  ;;  %v104_v1 = vld [vmem:[%s156_s1] sm:$0xff] }
   0x2   :  { %62 = vmatpush.bf16.msra.mxu0 %v105_v0  ;;  %106 = vmatpush.bf16.msra.mxu1 %v105_v0  ;;  %v102_v2 = vld [vmem:[%s158_s0] sm:$0xff]  ;;  %v103_v3 = vld [vmem:[%s158_s0 + $0x8] sm:$0xff] }
   0x3   :  { %v108_v4 = vld [vmem:[%s157_s2] ss:$0 sm:$0xff] }
   0x6   :  { %63 = vmatpush.bf16.msra.mxu0 %v104_v1  ;;  %107 = vmatpush.bf16.msra.mxu1 %v104_v1 }
   0x9   :  { %100 = vmatmul.msk.bf16.vlgmr.msra.gmra.mxu0 %vm49_vm0, %v102_v2  ;;  %101 = vmatmul.msk.bf16.vlgmr.msra.gmra.mxu1 %vm49_vm0, %v103_v3 }
  0x86   :  { %v65_v5 = vpop.f32.mrf.mxu0  ;;  %v70_v6 = vpop.f32.mrf.mxu1 }
  0x87   :  { %v66_v7 = vadd.f32 %v108_v4, %v65_v5  ;;  %v71_v8 = vadd.f32 %v108_v4, %v70_v6 }
  0x89   :  { %76 = vst.msk [vmem:[%s159_s3] sm:$0xff] %vm75_vm1, %v66_v7 }
  0x8a   :  { %78 = vst.msk [vmem:[%s159_s3 + $0x10] sm:$0xff] %vm75_vm1, %v71_v8 }
  0x8e   :  { %v67_v9 = vpop.f32.mrf.mxu0  ;;  %v72_v10 = vpop.f32.mrf.mxu1 }
  0x8f   :  { %v68_v11 = vadd.f32 %v108_v4, %v67_v9  ;;  %v73_v12 = vadd.f32 %v108_v4, %v72_v10 }
  0x91   :  { %77 = vst.msk [vmem:[%s159_s3 + $0x8] sm:$0xff] %vm75_vm1, %v68_v11 }
  0x92   :  { %79 = vst.msk [vmem:[%s159_s3 + $0x18] sm:$0xff] %vm75_vm1, %v73_v12 }

</bundles_post_ra>
